<compile_context>
chip_gen: v7x
topology: tpu7x:2x2x1
jax: 0.10.0
libtpu: 0.0.40
codegen_flags: <defaults>
</compile_context>

<pallas_src>
import functools

import jax
import jax.numpy as jnp
from jax.experimental import pallas as pl
from jax.experimental.pallas import tpu as pltpu

# -------------------------- configuration ----------------------------------
CFG = dict(
    PC_DIM=4,
    LATENT_DIM=4,
    HIDDEN_DIM=32,
    NUM_NET_LAYERS=3,        # first + (NUM-2) hidden + output linear
    NUM_COUPLING_LAYERS=4,
    FIELD_DIM=16,
)
NEG_SLOPE = 0.01             # nn.LeakyReLU default


# ----------------------------- Pallas kernel --------------------------------
def nice_fused_kernel(pc_ref, h_ref,
                      w1_ref, b1_ref, wm_ref, bm_ref, wo_ref, bo_ref,
                      z_ref, ld_ref, z2_ref,
                      *, num_hidden, pc_dim):
    """All coupling layers for one (batch, point-tile), channel-major.

    pc_ref: [1, PC_DIM, TN]   point cloud tile (channels x points)
    h_ref:  [1, LATENT, 1]    encoder latent for this batch element
    w1/b1:  [L, 2H, D] / [L, 2H, 1]      fused s|t first layer (mask folded in)
    wm/bm:  [L, Lm, 2H, 2H] / [L, Lm, 2H, 1]  block-diag hidden layers
    wo/bo:  [L, 2D, 2H] / [L, 2D, 1]     fused s|t output layer ((1-mask) folded in)
    z_ref:  [1, D, TN]        flow output
    ld_ref: [1, 1, TN]        per-point log-det (summed over layers+channels)
    z2_ref: [1, 1, TN]        per-point sum of z_latent^2 (prior epilogue)
    """
    D = z_ref.shape[1]
    TN = pc_ref.shape[2]
    lat = D - pc_dim
    L = w1_ref.shape[0]

    # Assemble x = [pc ; broadcast(h)] in channel-major layout without any
    # XLA-side repeat/concat and without unaligned in-kernel concatenation:
    # two tiny exact 0/1 placement matmuls (channels on sublanes).
    r = jax.lax.broadcasted_iota(jnp.int32, (D, pc_dim), 0)
    c = jax.lax.broadcasted_iota(jnp.int32, (D, pc_dim), 1)
    put_pc = (r == c).astype(jnp.float32)                       # [D, PC]
    r2 = jax.lax.broadcasted_iota(jnp.int32, (D, lat), 0)
    c2 = jax.lax.broadcasted_iota(jnp.int32, (D, lat), 1)
    put_h = (r2 == (c2 + pc_dim)).astype(jnp.float32)           # [D, LAT]

    x = (jnp.dot(put_pc, pc_ref[0], preferred_element_type=jnp.float32)
         + jnp.dot(put_h, h_ref[0], preferred_element_type=jnp.float32))  # [D, TN]

    ld = jnp.zeros((1, TN), jnp.float32)

    for l in range(L):                                           # statically unrolled
        # fused s|t first layer (input mask already folded into the weights)
        a = jnp.dot(w1_ref[l], x, preferred_element_type=jnp.float32) + b1_ref[l]
        a = jnp.maximum(a, NEG_SLOPE * a)                        # LeakyReLU (VPU)
        for m in range(num_hidden):                              # block-diag hidden
            a = jnp.dot(wm_ref[l, m], a, preferred_element_type=jnp.float32) + bm_ref[l, m]
            a = jnp.maximum(a, NEG_SLOPE * a)
        out = jnp.dot(wo_ref[l], a, preferred_element_type=jnp.float32) + bo_ref[l]

        s = jnp.tanh(out[:D])        # zero on conditioning channels (mask folded)
        t = out[D:]                  # zero on conditioning channels (mask folded)
        x = x * jnp.exp(s) + t       # identity on conditioning channels (exp(0)=1)
        ld = ld + jnp.sum(s, axis=0, keepdims=True)              # sublane reduce (XLU)

    z_ref[0] = x
    ld_ref[0] = ld

    # prior epilogue: sum of squared latent channels per point (mask via iota,
    # keeps everything 8-sublane aligned)
    rows = jax.lax.broadcasted_iota(jnp.int32, (D, 1), 0)
    lat_mask = (rows >= pc_dim).astype(jnp.float32)              # [D, 1]
    z2_ref[0] = jnp.sum(lat_mask * x * x, axis=0, keepdims=True)


# ------------------------ weight packing / folding --------------------------
def _pack_coupling(params, cfg):
    """Fold masks into weights, fuse s/t nets, transpose to channel-major."""
    D = cfg["PC_DIM"] + cfg["LATENT_DIM"]
    H = cfg["HIDDEN_DIM"]
    Lm = max(cfg["NUM_NET_LAYERS"] - 2, 0)

    W1, B1, WM, BM, WO, BO = [], [], [], [], [], []
    for p, mask in zip(params["coupling"], params["masks"]):
        m = mask.reshape(D, 1)                       # 1 = conditioning channel
        om = 1.0 - m
        # first layer: x*m folded into the weight columns; s|t fused -> [2H, D]
        w1 = jnp.concatenate([(p["w1s"] * m).T, (p["w1t"] * m).T], axis=0)
        b1 = jnp.concatenate([p["b1s"].T, p["b1t"].T], axis=0)   # [2H, 1]

        # hidden layers: block-diagonal so fused s|t needs one matmul each
        wm_l, bm_l = [], []
        for li in range(Lm):
            zh = jnp.zeros((H, H), jnp.float32)
            top = jnp.concatenate([p["wms"][li].T, zh], axis=1)
            bot = jnp.concatenate([zh, p["wmt"][li].T], axis=1)
            wm_l.append(jnp.concatenate([top, bot], axis=0))                 # [2H, 2H]
            bm_l.append(jnp.concatenate([p["bms"][li].T, p["bmt"][li].T], axis=0))
        if Lm:
            WM.append(jnp.stack(wm_l))
            BM.append(jnp.stack(bm_l))
        else:   # dummy (never read; kernel loops range(num_hidden)=0 times)
            WM.append(jnp.zeros((1, 2 * H, 2 * H), jnp.float32))
            BM.append(jnp.zeros((1, 2 * H, 1), jnp.float32))

        # output layer: (1-mask) gating folded into rows; s|t fused -> [2D, 2H]
        zo = jnp.zeros((D, H), jnp.float32)
        wo_s = p["wos"].T * om
        wo_t = p["wot"].T * om
        wo = jnp.concatenate([jnp.concatenate([wo_s, zo], axis=1),
                              jnp.concatenate([zo, wo_t], axis=1)], axis=0)  # [2D, 2H]
        bo = jnp.concatenate([p["bos"].T * om, p["bot"].T * om], axis=0)     # [2D, 1]

        W1.append(w1); B1.append(b1); WO.append(wo); BO.append(bo)

    return dict(w1=jnp.stack(W1), b1=jnp.stack(B1),
                wm=jnp.stack(WM), bm=jnp.stack(BM),
                wo=jnp.stack(WO), bo=jnp.stack(BO),
                num_hidden=Lm)


def _pick_tiling(n):
    """Point-tile size + padded extent (lane-dense, amortized pipeline cost)."""
    if n >= 512:
        tile = 512
    else:
        tile = max(128, ((n + 127) // 128) * 128)
    n_pad = ((n + tile - 1) // tile) * tile
    return tile, n_pad


# ------------------------------ forward pass ---------------------------------
def nice_forward(params, x, pc, npoint, cfg):
    """x: [B, FIELD_DIM], pc: [B, PC_DIM, npoint] -> (z [B, D, npoint], log_likelihood [B])."""
    pc_dim = cfg["PC_DIM"]
    lat = cfg["LATENT_DIM"]
    D = pc_dim + lat
    B = pc.shape[0]
    N = pc.shape[2]
    assert N == npoint

    # encoder (tiny glue matmul): Linear(FIELD_DIM -> LATENT_DIM)
    h_enc = (x @ params["enc_w"] + params["enc_b"]).astype(jnp.float32)   # [B, LATENT]
    h_enc = h_enc.reshape(B, lat, 1)

    pk = _pack_coupling(params, cfg)

    tile_n, n_pad = _pick_tiling(N)
    pc_f = pc.astype(jnp.float32)
    if n_pad != N:
        pc_f = jnp.pad(pc_f, ((0, 0), (0, 0), (0, n_pad - N)))

    grid = (B, n_pad // tile_n)

    def full(shape):
        ndim = len(shape)
        return pl.BlockSpec(shape, lambda b, t, _n=ndim: (0,) * _n)

    in_specs = [
        pl.BlockSpec((1, pc_dim, tile_n), lambda b, t: (b, 0, t)),   # pc tile
        pl.BlockSpec((1, lat, 1), lambda b, t: (b, 0, 0)),           # encoder latent
        full(pk["w1"].shape), full(pk["b1"].shape),
        full(pk["wm"].shape), full(pk["bm"].shape),
        full(pk["wo"].shape), full(pk["bo"].shape),
    ]
    out_specs = [
        pl.BlockSpec((1, D, tile_n), lambda b, t: (b, 0, t)),        # z
        pl.BlockSpec((1, 1, tile_n), lambda b, t: (b, 0, t)),        # per-point log-det
        pl.BlockSpec((1, 1, tile_n), lambda b, t: (b, 0, t)),        # per-point sum z_lat^2
    ]

    kern = functools.partial(nice_fused_kernel,
                             num_hidden=pk["num_hidden"], pc_dim=pc_dim)

    z_pad, ld_pad, z2_pad = pl.pallas_call(
        kern,
        out_shape=[jax.ShapeDtypeStruct((B, D, n_pad), jnp.float32),
                   jax.ShapeDtypeStruct((B, 1, n_pad), jnp.float32),
                   jax.ShapeDtypeStruct((B, 1, n_pad), jnp.float32)],
        grid=grid,
        in_specs=in_specs,
        out_specs=out_specs,
        compiler_params=pltpu.CompilerParams(
            dimension_semantics=("parallel", "parallel")),
    )(pc_f, h_enc, pk["w1"], pk["b1"], pk["wm"], pk["bm"], pk["wo"], pk["bo"])

    z = z_pad[:, :, :N]                                           # [B, D, N] (NCL, like PyTorch)
    log_det = jnp.sum(ld_pad[:, 0, :N], axis=-1)                  # [B]
    z2 = jnp.sum(z2_pad[:, 0, :N], axis=-1)                       # [B]
    log_prob = -0.5 * (z2 + lat * N * jnp.log(2.0 * jnp.pi))      # unit-Gaussian prior
    return z, log_prob + log_det


# --------------------------- parameter setup --------------------------------
def _init_linear(key, fan_in, fan_out):
    k1, k2 = jax.random.split(key)
    bound = 1.0 / float(fan_in) ** 0.5
    w = jax.random.uniform(k1, (fan_in, fan_out), jnp.float32, -bound, bound)
    b = jax.random.uniform(k2, (1, fan_out), jnp.float32, -bound, bound)
    return w, b


def init_params(key, cfg):
    D = cfg["PC_DIM"] + cfg["LATENT_DIM"]
    H = cfg["HIDDEN_DIM"]
    L = cfg["NUM_NET_LAYERS"]
    Lm = max(L - 2, 0)

    keys = jax.random.split(key, 4 + cfg["NUM_COUPLING_LAYERS"])
    enc_w, enc_b = _init_linear(keys[0], cfg["FIELD_DIM"], cfg["LATENT_DIM"])
    dec_w, dec_b = _init_linear(keys[1], cfg["LATENT_DIM"], cfg["FIELD_DIM"])  # unused in fwd

    def init_net(k):
        ks = jax.random.split(k, 2 + Lm)
        w1, b1 = _init_linear(ks[0], D, H)
        wms, bms = [], []
        for l in range(Lm):
            wm, bm = _init_linear(ks[1 + l], H, H)
            wms.append(wm)
            bms.append(bm)
        wo, bo = _init_linear(ks[-1], H, D)
        wms = jnp.stack(wms) if Lm else jnp.zeros((0, H, H), jnp.float32)
        bms = jnp.stack(bms) if Lm else jnp.zeros((0, 1, H), jnp.float32)
        return w1, b1, wms, bms, wo, bo

    coupling = []
    for i in range(cfg["NUM_COUPLING_LAYERS"]):
        ks, kt = jax.random.split(keys[4 + i])
        w1s, b1s, wms, bms, wos, bos = init_net(ks)
        w1t, b1t, wmt, bmt, wot, bot = init_net(kt)
        coupling.append(dict(w1s=w1s, b1s=b1s, wms=wms, bms=bms, wos=wos, bos=bos,
                             w1t=w1t, b1t=b1t, wmt=wmt, bmt=bmt, wot=wot, bot=bot))

    # masks: base = 1 at even channel indices; orientation (i % 2 == 0) flips it
    base = jnp.zeros((D,), jnp.float32).at[::2].set(1.0)
    masks = [jnp.reshape(1.0 - base if (i % 2 == 0) else base, (1, D))
             for i in range(cfg["NUM_COUPLING_LAYERS"])]

    return dict(enc_w=enc_w, enc_b=enc_b, dec_w=dec_w, dec_b=dec_b,
                coupling=coupling, masks=masks)


# -------------------------- pure-JAX reference -------------------------------
def _ref_forward(params, x, pc, npoint, cfg):
    pc_dim = cfg["PC_DIM"]
    h = x @ params["enc_w"] + params["enc_b"]
    h = jnp.repeat(h[:, :, None], npoint, axis=2)
    xin = jnp.concatenate([pc, h], axis=1)
    B, D, N = xin.shape
    xf = jnp.transpose(xin, (0, 2, 1)).reshape(B * N, D)

    def mlp(xm, w1, b1, wms, bms, wo, bo):
        a = xm @ w1 + b1
        a = jnp.where(a > 0, a, NEG_SLOPE * a)
        for l in range(wms.shape[0]):
            a = a @ wms[l] + bms[l]
            a = jnp.where(a > 0, a, NEG_SLOPE * a)
        return a @ wo + bo

    ld = jnp.zeros((B * N, 1), jnp.float32)
    for p, m in zip(params["coupling"], params["masks"]):
        xm = xf * m
        s = jnp.tanh(mlp(xm, p["w1s"], p["b1s"], p["wms"], p["bms"], p["wos"], p["bos"])) * (1 - m)
        t = mlp(xm, p["w1t"], p["b1t"], p["wmt"], p["bmt"], p["wot"], p["bot"]) * (1 - m)
        xf = xm + (1 - m) * (xf * jnp.exp(s) + t)
        ld = ld + jnp.sum(s, axis=-1, keepdims=True)

    z = jnp.transpose(xf.reshape(B, N, D), (0, 2, 1))
    log_det = jnp.sum(ld.reshape(B, N), axis=1)
    z_lat = z[:, pc_dim:, :]
    log_prob = -0.5 * jnp.sum(z_lat * z_lat + jnp.log(2.0 * jnp.pi), axis=(1, 2))
    return z, log_prob + log_det


# --------------------------------- main --------------------------------------
if __name__ == "__main__":
    key = jax.random.PRNGKey(0)
    k_param, k_x, k_pc = jax.random.split(key, 3)

    B, npoint = 2, 128
    params = init_params(k_param, CFG)
    x = jax.random.normal(k_x, (B, CFG["FIELD_DIM"]), jnp.float32)
    pc = jax.random.normal(k_pc, (B, CFG["PC_DIM"], npoint), jnp.float32)

    fwd = jax.jit(functools.partial(nice_forward, npoint=npoint, cfg=CFG))
    z, log_likelihood = fwd(params, x, pc)
    jax.block_until_ready((z, log_likelihood))

    z_ref, ll_ref = _ref_forward(params, x, pc, npoint, CFG)
    assert jnp.allclose(z, z_ref, atol=1e-4, rtol=1e-4), "z mismatch vs reference"
    assert jnp.allclose(log_likelihood, ll_ref, atol=1e-3, rtol=1e-4), "log-likelihood mismatch"

    print("KERNEL_OK")
</pallas_src>

<mosaic_0001>
module attributes {stable_mosaic.version = 11 : i64} {
  func.func @nice_fused_kernel(%arg0: i32, %arg1: i32, %arg2: memref<1x4x128xf32, #tpu.memory_space<vmem>>, %arg3: memref<1x4x1xf32, #tpu.memory_space<vmem>>, %arg4: memref<4x64x8xf32, #tpu.memory_space<vmem>>, %arg5: memref<4x64x1xf32, #tpu.memory_space<vmem>>, %arg6: memref<4x1x64x64xf32, #tpu.memory_space<vmem>>, %arg7: memref<4x1x64x1xf32, #tpu.memory_space<vmem>>, %arg8: memref<4x16x64xf32, #tpu.memory_space<vmem>>, %arg9: memref<4x16x1xf32, #tpu.memory_space<vmem>>, %arg10: memref<1x8x128xf32, #tpu.memory_space<vmem>>, %arg11: memref<1x1x128xf32, #tpu.memory_space<vmem>>, %arg12: memref<1x1x128xf32, #tpu.memory_space<vmem>>) attributes {dimension_semantics = [#tpu.dimension_semantics<parallel>, #tpu.dimension_semantics<parallel>], iteration_bounds = array<i64: 2, 1>, scalar_prefetch = 0 : i64, scratch_operands = 0 : i64, tpu.core_type = #tpu.core_type<tc>, window_params = [{transform_indices = @transform_0, window_bounds = array<i64: 1, 4, 128>}, {transform_indices = @transform_1, window_bounds = array<i64: 1, 4, 1>}, {pipeline_mode = #tpu.pipeline_mode<synchronous>, transform_indices = @transform_2, window_bounds = array<i64: 4, 64, 8>}, {pipeline_mode = #tpu.pipeline_mode<synchronous>, transform_indices = @transform_3, window_bounds = array<i64: 4, 64, 1>}, {pipeline_mode = #tpu.pipeline_mode<synchronous>, transform_indices = @transform_4, window_bounds = array<i64: 4, 1, 64, 64>}, {pipeline_mode = #tpu.pipeline_mode<synchronous>, transform_indices = @transform_5, window_bounds = array<i64: 4, 1, 64, 1>}, {pipeline_mode = #tpu.pipeline_mode<synchronous>, transform_indices = @transform_6, window_bounds = array<i64: 4, 16, 64>}, {pipeline_mode = #tpu.pipeline_mode<synchronous>, transform_indices = @transform_7, window_bounds = array<i64: 4, 16, 1>}, {transform_indices = @transform_8, window_bounds = array<i64: 1, 8, 128>}, {transform_indices = @transform_9, window_bounds = array<i64: 1, 1, 128>}, {transform_indices = @transform_10, window_bounds = array<i64: 1, 1, 128>}]} {
    %0 = tpu.iota {dimensions = array<i32: 0>} : vector<8x4xi32>
    %1 = tpu.iota {dimensions = array<i32: 1>} : vector<8x4xi32>
    %2 = arith.cmpi eq, %0, %1 : vector<8x4xi32>
    %3 = arith.extui %2 : vector<8x4xi1> to vector<8x4xi32>
    %4 = arith.sitofp %3 : vector<8x4xi32> to vector<8x4xf32>
    %5 = tpu.iota {dimensions = array<i32: 0>} : vector<8x4xi32>
    %6 = tpu.iota {dimensions = array<i32: 1>} : vector<8x4xi32>
    %c4_i32 = arith.constant 4 : i32
    %7 = vector.broadcast %c4_i32 : i32 to vector<8x4xi32>
    %8 = arith.addi %6, %7 : vector<8x4xi32>
    %9 = arith.cmpi eq, %5, %8 : vector<8x4xi32>
    %10 = arith.extui %9 : vector<8x4xi1> to vector<8x4xi32>
    %11 = arith.sitofp %10 : vector<8x4xi32> to vector<8x4xf32>
    %c0 = arith.constant 0 : index
    %c0_0 = arith.constant 0 : index
    %c0_1 = arith.constant 0 : index
    %12 = vector.load %arg2[%c0, %c0_0, %c0_1] : memref<1x4x128xf32, #tpu.memory_space<vmem>>, vector<1x4x128xf32>
    %13 = vector.shape_cast %12 : vector<1x4x128xf32> to vector<4x128xf32>
    %cst = arith.constant dense<0.000000e+00> : vector<8x128xf32>
    %14 = tpu.matmul %4, %13, %cst {dimension_numbers = #tpu.dot_dimension_numbers<[1], [0], [0], [1], [0, 0, 1, 1], [], []>} : vector<8x4xf32>, vector<4x128xf32>, vector<8x128xf32> -> vector<8x128xf32>
    %c0_2 = arith.constant 0 : index
    %c0_3 = arith.constant 0 : index
    %c0_4 = arith.constant 0 : index
    %15 = vector.load %arg3[%c0_2, %c0_3, %c0_4] : memref<1x4x1xf32, #tpu.memory_space<vmem>>, vector<1x4x1xf32>
    %16 = vector.shape_cast %15 : vector<1x4x1xf32> to vector<4x1xf32>
    %cst_5 = arith.constant dense<0.000000e+00> : vector<8x1xf32>
    %17 = tpu.matmul %11, %16, %cst_5 {dimension_numbers = #tpu.dot_dimension_numbers<[1], [0], [0], [1], [0, 0, 1, 1], [], []>} : vector<8x4xf32>, vector<4x1xf32>, vector<8x1xf32> -> vector<8x1xf32>
    %18 = vector.broadcast %17 : vector<8x1xf32> to vector<8x128xf32>
    %19 = arith.addf %14, %18 : vector<8x128xf32>
    %cst_6 = arith.constant 0.000000e+00 : f32
    %20 = vector.broadcast %cst_6 : f32 to vector<1x128xf32>
    %c0_7 = arith.constant 0 : index
    %c0_8 = arith.constant 0 : index
    %c0_9 = arith.constant 0 : index
    %21 = vector.load %arg4[%c0_7, %c0_8, %c0_9] : memref<4x64x8xf32, #tpu.memory_space<vmem>>, vector<1x64x8xf32>
    %22 = vector.shape_cast %21 : vector<1x64x8xf32> to vector<64x8xf32>
    %cst_10 = arith.constant dense<0.000000e+00> : vector<64x128xf32>
    %23 = tpu.matmul %22, %19, %cst_10 {dimension_numbers = #tpu.dot_dimension_numbers<[1], [0], [0], [1], [0, 0, 1, 1], [], []>} : vector<64x8xf32>, vector<8x128xf32>, vector<64x128xf32> -> vector<64x128xf32>
    %c0_11 = arith.constant 0 : index
    %c0_12 = arith.constant 0 : index
    %c0_13 = arith.constant 0 : index
    %24 = vector.load %arg5[%c0_11, %c0_12, %c0_13] : memref<4x64x1xf32, #tpu.memory_space<vmem>>, vector<1x64x1xf32>
    %25 = vector.shape_cast %24 : vector<1x64x1xf32> to vector<64x1xf32>
    %26 = vector.broadcast %25 : vector<64x1xf32> to vector<64x128xf32>
    %27 = arith.addf %23, %26 : vector<64x128xf32>
    %cst_14 = arith.constant 0.00999999977 : f32
    %28 = vector.broadcast %cst_14 : f32 to vector<64x128xf32>
    %29 = arith.mulf %28, %27 : vector<64x128xf32>
    %30 = arith.maximumf %27, %29 : vector<64x128xf32>
    %c0_15 = arith.constant 0 : index
    %c0_16 = arith.constant 0 : index
    %c0_17 = arith.constant 0 : index
    %c0_18 = arith.constant 0 : index
    %31 = vector.load %arg6[%c0_15, %c0_16, %c0_17, %c0_18] : memref<4x1x64x64xf32, #tpu.memory_space<vmem>>, vector<1x1x64x64xf32>
    %32 = vector.shape_cast %31 : vector<1x1x64x64xf32> to vector<64x64xf32>
    %cst_19 = arith.constant dense<0.000000e+00> : vector<64x128xf32>
    %33 = tpu.matmul %32, %30, %cst_19 {dimension_numbers = #tpu.dot_dimension_numbers<[1], [0], [0], [1], [0, 0, 1, 1], [], []>} : vector<64x64xf32>, vector<64x128xf32>, vector<64x128xf32> -> vector<64x128xf32>
    %c0_20 = arith.constant 0 : index
    %c0_21 = arith.constant 0 : index
    %c0_22 = arith.constant 0 : index
    %c0_23 = arith.constant 0 : index
    %34 = vector.load %arg7[%c0_20, %c0_21, %c0_22, %c0_23] : memref<4x1x64x1xf32, #tpu.memory_space<vmem>>, vector<1x1x64x1xf32>
    %35 = vector.shape_cast %34 : vector<1x1x64x1xf32> to vector<64x1xf32>
    %36 = vector.broadcast %35 : vector<64x1xf32> to vector<64x128xf32>
    %37 = arith.addf %33, %36 : vector<64x128xf32>
    %cst_24 = arith.constant 0.00999999977 : f32
    %38 = vector.broadcast %cst_24 : f32 to vector<64x128xf32>
    %39 = arith.mulf %38, %37 : vector<64x128xf32>
    %40 = arith.maximumf %37, %39 : vector<64x128xf32>
    %c0_25 = arith.constant 0 : index
    %c0_26 = arith.constant 0 : index
    %c0_27 = arith.constant 0 : index
    %41 = vector.load %arg8[%c0_25, %c0_26, %c0_27] : memref<4x16x64xf32, #tpu.memory_space<vmem>>, vector<1x16x64xf32>
    %42 = vector.shape_cast %41 : vector<1x16x64xf32> to vector<16x64xf32>
    %cst_28 = arith.constant dense<0.000000e+00> : vector<16x128xf32>
    %43 = tpu.matmul %42, %40, %cst_28 {dimension_numbers = #tpu.dot_dimension_numbers<[1], [0], [0], [1], [0, 0, 1, 1], [], []>} : vector<16x64xf32>, vector<64x128xf32>, vector<16x128xf32> -> vector<16x128xf32>
    %c0_29 = arith.constant 0 : index
    %c0_30 = arith.constant 0 : index
    %c0_31 = arith.constant 0 : index
    %44 = vector.load %arg9[%c0_29, %c0_30, %c0_31] : memref<4x16x1xf32, #tpu.memory_space<vmem>>, vector<1x16x1xf32>
    %45 = vector.shape_cast %44 : vector<1x16x1xf32> to vector<16x1xf32>
    %46 = vector.broadcast %45 : vector<16x1xf32> to vector<16x128xf32>
    %47 = arith.addf %43, %46 : vector<16x128xf32>
    %48 = vector.extract_strided_slice %47 {offsets = [0, 0], sizes = [8, 128], strides = [1, 1]} : vector<16x128xf32> to vector<8x128xf32>
    %49 = math.tanh %48 : vector<8x128xf32>
    %50 = vector.extract_strided_slice %47 {offsets = [8, 0], sizes = [8, 128], strides = [1, 1]} : vector<16x128xf32> to vector<8x128xf32>
    %51 = math.exp %49 : vector<8x128xf32>
    %52 = arith.mulf %19, %51 : vector<8x128xf32>
    %53 = arith.addf %52, %50 : vector<8x128xf32>
    %cst_32 = arith.constant dense<0.000000e+00> : vector<128xf32>
    %54 = vector.multi_reduction <add>, %49, %cst_32 [0] : vector<8x128xf32> to vector<128xf32>
    %55 = vector.shape_cast %54 : vector<128xf32> to vector<1x128xf32>
    %56 = arith.addf %20, %55 : vector<1x128xf32>
    %c1 = arith.constant 1 : index
    %c0_33 = arith.constant 0 : index
    %c0_34 = arith.constant 0 : index
    %57 = vector.load %arg4[%c1, %c0_33, %c0_34] : memref<4x64x8xf32, #tpu.memory_space<vmem>>, vector<1x64x8xf32>
    %58 = vector.shape_cast %57 : vector<1x64x8xf32> to vector<64x8xf32>
    %cst_35 = arith.constant dense<0.000000e+00> : vector<64x128xf32>
    %59 = tpu.matmul %58, %53, %cst_35 {dimension_numbers = #tpu.dot_dimension_numbers<[1], [0], [0], [1], [0, 0, 1, 1], [], []>} : vector<64x8xf32>, vector<8x128xf32>, vector<64x128xf32> -> vector<64x128xf32>
    %c1_36 = arith.constant 1 : index
    %c0_37 = arith.constant 0 : index
    %c0_38 = arith.constant 0 : index
    %60 = vector.load %arg5[%c1_36, %c0_37, %c0_38] : memref<4x64x1xf32, #tpu.memory_space<vmem>>, vector<1x64x1xf32>
    %61 = vector.shape_cast %60 : vector<1x64x1xf32> to vector<64x1xf32>
    %62 = vector.broadcast %61 : vector<64x1xf32> to vector<64x128xf32>
    %63 = arith.addf %59, %62 : vector<64x128xf32>
    %cst_39 = arith.constant 0.00999999977 : f32
    %64 = vector.broadcast %cst_39 : f32 to vector<64x128xf32>
    %65 = arith.mulf %64, %63 : vector<64x128xf32>
    %66 = arith.maximumf %63, %65 : vector<64x128xf32>
    %c1_40 = arith.constant 1 : index
    %c0_41 = arith.constant 0 : index
    %c0_42 = arith.constant 0 : index
    %c0_43 = arith.constant 0 : index
    %67 = vector.load %arg6[%c1_40, %c0_41, %c0_42, %c0_43] : memref<4x1x64x64xf32, #tpu.memory_space<vmem>>, vector<1x1x64x64xf32>
    %68 = vector.shape_cast %67 : vector<1x1x64x64xf32> to vector<64x64xf32>
    %cst_44 = arith.constant dense<0.000000e+00> : vector<64x128xf32>
    %69 = tpu.matmul %68, %66, %cst_44 {dimension_numbers = #tpu.dot_dimension_numbers<[1], [0], [0], [1], [0, 0, 1, 1], [], []>} : vector<64x64xf32>, vector<64x128xf32>, vector<64x128xf32> -> vector<64x128xf32>
    %c1_45 = arith.constant 1 : index
    %c0_46 = arith.constant 0 : index
    %c0_47 = arith.constant 0 : index
    %c0_48 = arith.constant 0 : index
    %70 = vector.load %arg7[%c1_45, %c0_46, %c0_47, %c0_48] : memref<4x1x64x1xf32, #tpu.memory_space<vmem>>, vector<1x1x64x1xf32>
    %71 = vector.shape_cast %70 : vector<1x1x64x1xf32> to vector<64x1xf32>
    %72 = vector.broadcast %71 : vector<64x1xf32> to vector<64x128xf32>
    %73 = arith.addf %69, %72 : vector<64x128xf32>
    %cst_49 = arith.constant 0.00999999977 : f32
    %74 = vector.broadcast %cst_49 : f32 to vector<64x128xf32>
    %75 = arith.mulf %74, %73 : vector<64x128xf32>
    %76 = arith.maximumf %73, %75 : vector<64x128xf32>
    %c1_50 = arith.constant 1 : index
    %c0_51 = arith.constant 0 : index
    %c0_52 = arith.constant 0 : index
    %77 = vector.load %arg8[%c1_50, %c0_51, %c0_52] : memref<4x16x64xf32, #tpu.memory_space<vmem>>, vector<1x16x64xf32>
    %78 = vector.shape_cast %77 : vector<1x16x64xf32> to vector<16x64xf32>
    %cst_53 = arith.constant dense<0.000000e+00> : vector<16x128xf32>
    %79 = tpu.matmul %78, %76, %cst_53 {dimension_numbers = #tpu.dot_dimension_numbers<[1], [0], [0], [1], [0, 0, 1, 1], [], []>} : vector<16x64xf32>, vector<64x128xf32>, vector<16x128xf32> -> vector<16x128xf32>
    %c1_54 = arith.constant 1 : index
    %c0_55 = arith.constant 0 : index
    %c0_56 = arith.constant 0 : index
    %80 = vector.load %arg9[%c1_54, %c0_55, %c0_56] : memref<4x16x1xf32, #tpu.memory_space<vmem>>, vector<1x16x1xf32>
    %81 = vector.shape_cast %80 : vector<1x16x1xf32> to vector<16x1xf32>
    %82 = vector.broadcast %81 : vector<16x1xf32> to vector<16x128xf32>
    %83 = arith.addf %79, %82 : vector<16x128xf32>
    %84 = vector.extract_strided_slice %83 {offsets = [0, 0], sizes = [8, 128], strides = [1, 1]} : vector<16x128xf32> to vector<8x128xf32>
    %85 = math.tanh %84 : vector<8x128xf32>
    %86 = vector.extract_strided_slice %83 {offsets = [8, 0], sizes = [8, 128], strides = [1, 1]} : vector<16x128xf32> to vector<8x128xf32>
    %87 = math.exp %85 : vector<8x128xf32>
    %88 = arith.mulf %53, %87 : vector<8x128xf32>
    %89 = arith.addf %88, %86 : vector<8x128xf32>
    %cst_57 = arith.constant dense<0.000000e+00> : vector<128xf32>
    %90 = vector.multi_reduction <add>, %85, %cst_57 [0] : vector<8x128xf32> to vector<128xf32>
    %91 = vector.shape_cast %90 : vector<128xf32> to vector<1x128xf32>
    %92 = arith.addf %56, %91 : vector<1x128xf32>
    %c2 = arith.constant 2 : index
    %c0_58 = arith.constant 0 : index
    %c0_59 = arith.constant 0 : index
    %93 = vector.load %arg4[%c2, %c0_58, %c0_59] : memref<4x64x8xf32, #tpu.memory_space<vmem>>, vector<1x64x8xf32>
    %94 = vector.shape_cast %93 : vector<1x64x8xf32> to vector<64x8xf32>
    %cst_60 = arith.constant dense<0.000000e+00> : vector<64x128xf32>
    %95 = tpu.matmul %94, %89, %cst_60 {dimension_numbers = #tpu.dot_dimension_numbers<[1], [0], [0], [1], [0, 0, 1, 1], [], []>} : vector<64x8xf32>, vector<8x128xf32>, vector<64x128xf32> -> vector<64x128xf32>
    %c2_61 = arith.constant 2 : index
    %c0_62 = arith.constant 0 : index
    %c0_63 = arith.constant 0 : index
    %96 = vector.load %arg5[%c2_61, %c0_62, %c0_63] : memref<4x64x1xf32, #tpu.memory_space<vmem>>, vector<1x64x1xf32>
    %97 = vector.shape_cast %96 : vector<1x64x1xf32> to vector<64x1xf32>
    %98 = vector.broadcast %97 : vector<64x1xf32> to vector<64x128xf32>
    %99 = arith.addf %95, %98 : vector<64x128xf32>
    %cst_64 = arith.constant 0.00999999977 : f32
    %100 = vector.broadcast %cst_64 : f32 to vector<64x128xf32>
    %101 = arith.mulf %100, %99 : vector<64x128xf32>
    %102 = arith.maximumf %99, %101 : vector<64x128xf32>
    %c2_65 = arith.constant 2 : index
    %c0_66 = arith.constant 0 : index
    %c0_67 = arith.constant 0 : index
    %c0_68 = arith.constant 0 : index
    %103 = vector.load %arg6[%c2_65, %c0_66, %c0_67, %c0_68] : memref<4x1x64x64xf32, #tpu.memory_space<vmem>>, vector<1x1x64x64xf32>
    %104 = vector.shape_cast %103 : vector<1x1x64x64xf32> to vector<64x64xf32>
    %cst_69 = arith.constant dense<0.000000e+00> : vector<64x128xf32>
    %105 = tpu.matmul %104, %102, %cst_69 {dimension_numbers = #tpu.dot_dimension_numbers<[1], [0], [0], [1], [0, 0, 1, 1], [], []>} : vector<64x64xf32>, vector<64x128xf32>, vector<64x128xf32> -> vector<64x128xf32>
    %c2_70 = arith.constant 2 : index
    %c0_71 = arith.constant 0 : index
    %c0_72 = arith.constant 0 : index
    %c0_73 = arith.constant 0 : index
    %106 = vector.load %arg7[%c2_70, %c0_71, %c0_72, %c0_73] : memref<4x1x64x1xf32, #tpu.memory_space<vmem>>, vector<1x1x64x1xf32>
    %107 = vector.shape_cast %106 : vector<1x1x64x1xf32> to vector<64x1xf32>
    %108 = vector.broadcast %107 : vector<64x1xf32> to vector<64x128xf32>
    %109 = arith.addf %105, %108 : vector<64x128xf32>
    %cst_74 = arith.constant 0.00999999977 : f32
    %110 = vector.broadcast %cst_74 : f32 to vector<64x128xf32>
    %111 = arith.mulf %110, %109 : vector<64x128xf32>
    %112 = arith.maximumf %109, %111 : vector<64x128xf32>
    %c2_75 = arith.constant 2 : index
    %c0_76 = arith.constant 0 : index
    %c0_77 = arith.constant 0 : index
    %113 = vector.load %arg8[%c2_75, %c0_76, %c0_77] : memref<4x16x64xf32, #tpu.memory_space<vmem>>, vector<1x16x64xf32>
    %114 = vector.shape_cast %113 : vector<1x16x64xf32> to vector<16x64xf32>
    %cst_78 = arith.constant dense<0.000000e+00> : vector<16x128xf32>
    %115 = tpu.matmul %114, %112, %cst_78 {dimension_numbers = #tpu.dot_dimension_numbers<[1], [0], [0], [1], [0, 0, 1, 1], [], []>} : vector<16x64xf32>, vector<64x128xf32>, vector<16x128xf32> -> vector<16x128xf32>
    %c2_79 = arith.constant 2 : index
    %c0_80 = arith.constant 0 : index
    %c0_81 = arith.constant 0 : index
    %116 = vector.load %arg9[%c2_79, %c0_80, %c0_81] : memref<4x16x1xf32, #tpu.memory_space<vmem>>, vector<1x16x1xf32>
    %117 = vector.shape_cast %116 : vector<1x16x1xf32> to vector<16x1xf32>
    %118 = vector.broadcast %117 : vector<16x1xf32> to vector<16x128xf32>
    %119 = arith.addf %115, %118 : vector<16x128xf32>
    %120 = vector.extract_strided_slice %119 {offsets = [0, 0], sizes = [8, 128], strides = [1, 1]} : vector<16x128xf32> to vector<8x128xf32>
    %121 = math.tanh %120 : vector<8x128xf32>
    %122 = vector.extract_strided_slice %119 {offsets = [8, 0], sizes = [8, 128], strides = [1, 1]} : vector<16x128xf32> to vector<8x128xf32>
    %123 = math.exp %121 : vector<8x128xf32>
    %124 = arith.mulf %89, %123 : vector<8x128xf32>
    %125 = arith.addf %124, %122 : vector<8x128xf32>
    %cst_82 = arith.constant dense<0.000000e+00> : vector<128xf32>
    %126 = vector.multi_reduction <add>, %121, %cst_82 [0] : vector<8x128xf32> to vector<128xf32>
    %127 = vector.shape_cast %126 : vector<128xf32> to vector<1x128xf32>
    %128 = arith.addf %92, %127 : vector<1x128xf32>
    %c3 = arith.constant 3 : index
    %c0_83 = arith.constant 0 : index
    %c0_84 = arith.constant 0 : index
    %129 = vector.load %arg4[%c3, %c0_83, %c0_84] : memref<4x64x8xf32, #tpu.memory_space<vmem>>, vector<1x64x8xf32>
    %130 = vector.shape_cast %129 : vector<1x64x8xf32> to vector<64x8xf32>
    %cst_85 = arith.constant dense<0.000000e+00> : vector<64x128xf32>
    %131 = tpu.matmul %130, %125, %cst_85 {dimension_numbers = #tpu.dot_dimension_numbers<[1], [0], [0], [1], [0, 0, 1, 1], [], []>} : vector<64x8xf32>, vector<8x128xf32>, vector<64x128xf32> -> vector<64x128xf32>
    %c3_86 = arith.constant 3 : index
    %c0_87 = arith.constant 0 : index
    %c0_88 = arith.constant 0 : index
    %132 = vector.load %arg5[%c3_86, %c0_87, %c0_88] : memref<4x64x1xf32, #tpu.memory_space<vmem>>, vector<1x64x1xf32>
    %133 = vector.shape_cast %132 : vector<1x64x1xf32> to vector<64x1xf32>
    %134 = vector.broadcast %133 : vector<64x1xf32> to vector<64x128xf32>
    %135 = arith.addf %131, %134 : vector<64x128xf32>
    %cst_89 = arith.constant 0.00999999977 : f32
    %136 = vector.broadcast %cst_89 : f32 to vector<64x128xf32>
    %137 = arith.mulf %136, %135 : vector<64x128xf32>
    %138 = arith.maximumf %135, %137 : vector<64x128xf32>
    %c3_90 = arith.constant 3 : index
    %c0_91 = arith.constant 0 : index
    %c0_92 = arith.constant 0 : index
    %c0_93 = arith.constant 0 : index
    %139 = vector.load %arg6[%c3_90, %c0_91, %c0_92, %c0_93] : memref<4x1x64x64xf32, #tpu.memory_space<vmem>>, vector<1x1x64x64xf32>
    %140 = vector.shape_cast %139 : vector<1x1x64x64xf32> to vector<64x64xf32>
    %cst_94 = arith.constant dense<0.000000e+00> : vector<64x128xf32>
    %141 = tpu.matmul %140, %138, %cst_94 {dimension_numbers = #tpu.dot_dimension_numbers<[1], [0], [0], [1], [0, 0, 1, 1], [], []>} : vector<64x64xf32>, vector<64x128xf32>, vector<64x128xf32> -> vector<64x128xf32>
    %c3_95 = arith.constant 3 : index
    %c0_96 = arith.constant 0 : index
    %c0_97 = arith.constant 0 : index
    %c0_98 = arith.constant 0 : index
    %142 = vector.load %arg7[%c3_95, %c0_96, %c0_97, %c0_98] : memref<4x1x64x1xf32, #tpu.memory_space<vmem>>, vector<1x1x64x1xf32>
    %143 = vector.shape_cast %142 : vector<1x1x64x1xf32> to vector<64x1xf32>
    %144 = vector.broadcast %143 : vector<64x1xf32> to vector<64x128xf32>
    %145 = arith.addf %141, %144 : vector<64x128xf32>
    %cst_99 = arith.constant 0.00999999977 : f32
    %146 = vector.broadcast %cst_99 : f32 to vector<64x128xf32>
    %147 = arith.mulf %146, %145 : vector<64x128xf32>
    %148 = arith.maximumf %145, %147 : vector<64x128xf32>
    %c3_100 = arith.constant 3 : index
    %c0_101 = arith.constant 0 : index
    %c0_102 = arith.constant 0 : index
    %149 = vector.load %arg8[%c3_100, %c0_101, %c0_102] : memref<4x16x64xf32, #tpu.memory_space<vmem>>, vector<1x16x64xf32>
    %150 = vector.shape_cast %149 : vector<1x16x64xf32> to vector<16x64xf32>
    %cst_103 = arith.constant dense<0.000000e+00> : vector<16x128xf32>
    %151 = tpu.matmul %150, %148, %cst_103 {dimension_numbers = #tpu.dot_dimension_numbers<[1], [0], [0], [1], [0, 0, 1, 1], [], []>} : vector<16x64xf32>, vector<64x128xf32>, vector<16x128xf32> -> vector<16x128xf32>
    %c3_104 = arith.constant 3 : index
    %c0_105 = arith.constant 0 : index
    %c0_106 = arith.constant 0 : index
    %152 = vector.load %arg9[%c3_104, %c0_105, %c0_106] : memref<4x16x1xf32, #tpu.memory_space<vmem>>, vector<1x16x1xf32>
    %153 = vector.shape_cast %152 : vector<1x16x1xf32> to vector<16x1xf32>
    %154 = vector.broadcast %153 : vector<16x1xf32> to vector<16x128xf32>
    %155 = arith.addf %151, %154 : vector<16x128xf32>
    %156 = vector.extract_strided_slice %155 {offsets = [0, 0], sizes = [8, 128], strides = [1, 1]} : vector<16x128xf32> to vector<8x128xf32>
    %157 = math.tanh %156 : vector<8x128xf32>
    %158 = vector.extract_strided_slice %155 {offsets = [8, 0], sizes = [8, 128], strides = [1, 1]} : vector<16x128xf32> to vector<8x128xf32>
    %159 = math.exp %157 : vector<8x128xf32>
    %160 = arith.mulf %125, %159 : vector<8x128xf32>
    %161 = arith.addf %160, %158 : vector<8x128xf32>
    %cst_107 = arith.constant dense<0.000000e+00> : vector<128xf32>
    %162 = vector.multi_reduction <add>, %157, %cst_107 [0] : vector<8x128xf32> to vector<128xf32>
    %163 = vector.shape_cast %162 : vector<128xf32> to vector<1x128xf32>
    %164 = arith.addf %128, %163 : vector<1x128xf32>
    %c0_108 = arith.constant 0 : index
    %c0_109 = arith.constant 0 : index
    %c0_110 = arith.constant 0 : index
    %165 = vector.load %arg10[%c0_108, %c0_109, %c0_110] : memref<1x8x128xf32, #tpu.memory_space<vmem>>, vector<1x8x128xf32>
    %166 = vector.shape_cast %165 : vector<1x8x128xf32> to vector<8x128xf32>
    %167 = vector.shape_cast %161 : vector<8x128xf32> to vector<1x8x128xf32>
    tpu.vector_store %arg10[%c0_108, %c0_109, %c0_110], %167 {strides = array<i32>} : memref<1x8x128xf32, #tpu.memory_space<vmem>>, vector<1x8x128xf32>,
    %c0_111 = arith.constant 0 : index
    %c0_112 = arith.constant 0 : index
    %c0_113 = arith.constant 0 : index
    %168 = vector.load %arg11[%c0_111, %c0_112, %c0_113] : memref<1x1x128xf32, #tpu.memory_space<vmem>>, vector<1x1x128xf32>
    %169 = vector.shape_cast %168 : vector<1x1x128xf32> to vector<1x128xf32>
    %170 = vector.shape_cast %164 : vector<1x128xf32> to vector<1x1x128xf32>
    tpu.vector_store %arg11[%c0_111, %c0_112, %c0_113], %170 {strides = array<i32>} : memref<1x1x128xf32, #tpu.memory_space<vmem>>, vector<1x1x128xf32>,
    %171 = tpu.iota {dimensions = array<i32: 0>} : vector<8x1xi32>
    %c4_i32_114 = arith.constant 4 : i32
    %172 = vector.broadcast %c4_i32_114 : i32 to vector<8x1xi32>
    %173 = arith.cmpi sge, %171, %172 : vector<8x1xi32>
    %174 = arith.extui %173 : vector<8x1xi1> to vector<8x1xi32>
    %175 = arith.sitofp %174 : vector<8x1xi32> to vector<8x1xf32>
    %176 = vector.broadcast %175 : vector<8x1xf32> to vector<8x128xf32>
    %177 = arith.mulf %176, %161 : vector<8x128xf32>
    %178 = arith.mulf %177, %161 : vector<8x128xf32>
    %cst_115 = arith.constant dense<0.000000e+00> : vector<128xf32>
    %179 = vector.multi_reduction <add>, %178, %cst_115 [0] : vector<8x128xf32> to vector<128xf32>
    %180 = vector.shape_cast %179 : vector<128xf32> to vector<1x128xf32>
    %c0_116 = arith.constant 0 : index
    %c0_117 = arith.constant 0 : index
    %c0_118 = arith.constant 0 : index
    %181 = vector.load %arg12[%c0_116, %c0_117, %c0_118] : memref<1x1x128xf32, #tpu.memory_space<vmem>>, vector<1x1x128xf32>
    %182 = vector.shape_cast %181 : vector<1x1x128xf32> to vector<1x128xf32>
    %183 = vector.shape_cast %180 : vector<1x128xf32> to vector<1x1x128xf32>
    tpu.vector_store %arg12[%c0_116, %c0_117, %c0_118], %183 {strides = array<i32>} : memref<1x1x128xf32, #tpu.memory_space<vmem>>, vector<1x1x128xf32>,
    return
  }
  func.func @transform_0(%arg0: i32, %arg1: i32) -> (i32, i32, i32) {
    %c0_i32 = arith.constant 0 : i32
    %c0_i32_0 = arith.constant 0 : i32
    return %arg0, %c0_i32, %arg1 : i32, i32, i32
  }
  func.func @transform_1(%arg0: i32, %arg1: i32) -> (i32, i32, i32) {
    %c0_i32 = arith.constant 0 : i32
    %c0_i32_0 = arith.constant 0 : i32
    %c0_i32_1 = arith.constant 0 : i32
    return %arg0, %c0_i32, %c0_i32_0 : i32, i32, i32
  }
  func.func @transform_2(%arg0: i32, %arg1: i32) -> (i32, i32, i32) {
    %c0_i32 = arith.constant 0 : i32
    %c0_i32_0 = arith.constant 0 : i32
    %c0_i32_1 = arith.constant 0 : i32
    %c0_i32_2 = arith.constant 0 : i32
    return %c0_i32, %c0_i32_0, %c0_i32_1 : i32, i32, i32
  }
  func.func @transform_3(%arg0: i32, %arg1: i32) -> (i32, i32, i32) {
    %c0_i32 = arith.constant 0 : i32
    %c0_i32_0 = arith.constant 0 : i32
    %c0_i32_1 = arith.constant 0 : i32
    %c0_i32_2 = arith.constant 0 : i32
    return %c0_i32, %c0_i32_0, %c0_i32_1 : i32, i32, i32
  }
  func.func @transform_4(%arg0: i32, %arg1: i32) -> (i32, i32, i32, i32) {
    %c0_i32 = arith.constant 0 : i32
    %c0_i32_0 = arith.constant 0 : i32
    %c0_i32_1 = arith.constant 0 : i32
    %c0_i32_2 = arith.constant 0 : i32
    %c0_i32_3 = arith.constant 0 : i32
    return %c0_i32, %c0_i32_0, %c0_i32_1, %c0_i32_2 : i32, i32, i32, i32
  }
  func.func @transform_5(%arg0: i32, %arg1: i32) -> (i32, i32, i32, i32) {
    %c0_i32 = arith.constant 0 : i32
    %c0_i32_0 = arith.constant 0 : i32
    %c0_i32_1 = arith.constant 0 : i32
    %c0_i32_2 = arith.constant 0 : i32
    %c0_i32_3 = arith.constant 0 : i32
    return %c0_i32, %c0_i32_0, %c0_i32_1, %c0_i32_2 : i32, i32, i32, i32
  }
  func.func @transform_6(%arg0: i32, %arg1: i32) -> (i32, i32, i32) {
    %c0_i32 = arith.constant 0 : i32
    %c0_i32_0 = arith.constant 0 : i32
    %c0_i32_1 = arith.constant 0 : i32
    %c0_i32_2 = arith.constant 0 : i32
    return %c0_i32, %c0_i32_0, %c0_i32_1 : i32, i32, i32
  }
  func.func @transform_7(%arg0: i32, %arg1: i32) -> (i32, i32, i32) {
    %c0_i32 = arith.constant 0 : i32
    %c0_i32_0 = arith.constant 0 : i32
    %c0_i32_1 = arith.constant 0 : i32
    %c0_i32_2 = arith.constant 0 : i32
    return %c0_i32, %c0_i32_0, %c0_i32_1 : i32, i32, i32
  }
  func.func @transform_8(%arg0: i32, %arg1: i32) -> (i32, i32, i32) {
    %c0_i32 = arith.constant 0 : i32
    %c0_i32_0 = arith.constant 0 : i32
    return %arg0, %c0_i32, %arg1 : i32, i32, i32
  }
  func.func @transform_9(%arg0: i32, %arg1: i32) -> (i32, i32, i32) {
    %c0_i32 = arith.constant 0 : i32
    %c0_i32_0 = arith.constant 0 : i32
    return %arg0, %c0_i32, %arg1 : i32, i32, i32
  }
  func.func @transform_10(%arg0: i32, %arg1: i32) -> (i32, i32, i32) {
    %c0_i32 = arith.constant 0 : i32
    %c0_i32_0 = arith.constant 0 : i32
    return %arg0, %c0_i32, %arg1 : i32, i32, i32
  }
}

</mosaic_0001>

<bundles_post_ra>
// kernel: nice_forward.1
= control target key start
LH: loop header
LB: loop body
LE: loop exit
PB: predicated region body
PF: predicated region fallthrough
CT: control target
= control target key end

     0   :  { %s4456_s0 = inlined_call_operand.vmem [shape: f32[2,4,128], index: 0, kind: input, shape index: {}]   ;;  %s4457_s1 = inlined_call_operand.vmem [shape: f32[2,4,1], index: 1, kind: input, shape index: {}]   ;;  %s4458_s2 = inlined_call_operand.vmem [shape: f32[4,64,8], index: 2, kind: input, shape index: {}]   ;;  %s4459_s3 = inlined_call_operand.vmem [shape: f32[4,64,1], index: 3, kind: input, shape index: {}]   ;;  %s4460_s4 = inlined_call_operand.vmem [shape: f32[4,1,64,64], index: 4, kind: input, shape index: {}]   ;;  %s4461_s5 = inlined_call_operand.vmem [shape: f32[4,1,64,1], index: 5, kind: input, shape index: {}]   ;;  %s4462_s6 = inlined_call_operand.vmem [shape: f32[4,16,64], index: 6, kind: input, shape index: {}]   ;;  %s4463_s7 = inlined_call_operand.vmem [shape: f32[4,16,1], index: 7, kind: input, shape index: {}]   ;;  %s4464_s8 = inlined_call_operand.hbm [shape: f32[2,8,128], index: 8, kind: output, shape index: {0}]   ;;  %s4465_s9 = inlined_call_operand.vmem [shape: f32[2,1,128], index: 9, kind: output, shape index: {1}]   ;;  %s4466_s10 = inlined_call_operand.vmem [shape: f32[2,1,128], index: 10, kind: output, shape index: {2}]  }
   0x1   :  { %4467 = sst [smem:[#allocation5_spill]] %s4456_s0 }
   0x2   :  { %4468 = sst [smem:[#allocation6_spill]] %s4457_s1 }
   0x3   :  { %16 = vsyncpa [#allocation3], 0 }
   0x4   :  { %18 = vsyncpa [#allocation3 + $0x1], 0  ;;  %s3780_s13 = smov 0   ;;  %s3782_s14 = smov 0  }
   0x5   :  { %s3784_s15 = smov 0   ;;  %s3786_s16 = smov 0  }
   0x6   :  { %s3788_s17 = smov 0   ;;  %s3790_s18 = smov 0  }
   0x7 LB: > { %s2840_s19 = sadd.s32 4294967295, %s3719_s18   ;;  %s2841_s20 = sadd.s32 4294967294, %s3719_s18   ;;  %s3719_s18 = sphi %s3790_s18, %s24_s18   ;;  %s3715_s17 = sphi %s3788_s17, %s4477_s17   ;;  %s3711_s16 = sphi %s3786_s16, %s4476_s16   ;;  %s3707_s15 = sphi %s3784_s15, %s4475_s15   ;;  %s3703_s14 = sphi %s3782_s14, %s4474_s14   ;;  %s3699_s13 = sphi %s3780_s13, %s4473_s13  }
   0x8   : > { %s36_s21 = sadd.s32 1, %s3715_s17  ;;  %s225_s22 = sadd.s32 1, %s3707_s15 }
   0x9   : > { %p38_p0 = scmp.ge.s32.totalorder %s36_s21, 2  ;;  %p235_p1 = scmp.ne.s32.totalorder %s3707_s15, %s3703_s14 }
   0xa   : > { %p236_p2 = scmp.eq.s32.totalorder %s2840_s19, 1  ;;  %p241_p3 = scmp.ne.s32.totalorder %s3703_s14, %s3699_s13 }
   0xb   : > { %s4479_s21 = smov (%p38_p0, %s36_s21), 0  ;;  %p242_p5 = scmp.eq.s32.totalorder %s2841_s20, 1 }
   0xc   : > { %p3820_p4 = por %p236_p2, %p235_p1  ;;  %s220_s24 = ssub.s32 %s3715_s17, %s4479_s21 }
   0xd   : > { %p2844_p6 = scmp.ge.s32.totalorder %s3719_s18, 1  ;;  %p223_p7 = scmp.eq.s32.totalorder %s220_s24, 0 }
   0xe   : > { %p3827_p8 = por %p242_p5, %p241_p3  ;;  %p351_p9 = scmp.lt.s32.totalorder %s3719_s18, 3 }
   0xf   : > { %s3833_s26 = scalar_select %p223_p7, %s3707_s15, %s225_s22  }
  0x10   : > { %p352_p10 = pnand %p2844_p6, %p351_p9 }
  0x11   : > { %p407_p11 = scmp.lt.s32.totalorder (!%p352_p10), %s3711_s16, 1  ;;  %v430_v0 = vlaneseq (!%p352_p10)  ;;  %v3721_v1 = vmov (!%p352_p10), 0.0   ;;  %vm3722_vm0 = vmmov (!%p352_p10), 0   ;;  %v3723_v4 = vmov (!%p352_p10), 0   ;;  %s4471_s1 = sld [smem:[#allocation6_spill]] (!%p352_p10)  ;;  %v611_v10 = vld [vmem:[%s4459_s3 + $0x8] sm:$0xff] (!%p352_p10) }
  0x12   : > { %355 = sbr.rel (%p352_p10) target bundleno = 3281 (0xcd1), region = 52  ;;  %3183 = vmatprep.subr.mxu0 (!%p352_p10), %v3721_v1  ;;  %3185 = vmatprep.mubr.msk.f32.mxu0 (!%p352_p10), %vm3722_vm0, %v3721_v1  ;;  %vm447_vm1 = vcmask (!%p352_p10), 1043456   ;;  %vm443_vm3 = vcmask (!%p352_p10), 31744   ;;  %s4472_s0 = sld [smem:[#allocation5_spill]] (!%p352_p10)  ;;  %v612_v11 = vld [vmem:[%s4459_s3 + $0x10] sm:$0xff] (!%p352_p10)  ;;  %v614_v12 = vld [vmem:[%s4459_s3 + $0x20] sm:$0xff] (!%p352_p10) }
  0x13   : > { %v3841_v2 = vshrl.u32 (!%p352_p10), %v430_v0, 7  ;;  %v433_v3 = vand.u32 (!%p352_p10), 127, %v430_v0  ;;  %3188 = vmatprep.subr.mxu1 (!%p352_p10), %v3721_v1  ;;  %3190 = vmatprep.mubr.msk.f32.mxu1 (!%p352_p10), %vm3722_vm0, %v3721_v1  ;;  %v616_v13 = vld [vmem:[%s4459_s3 + $0x30] sm:$0xff] (!%p352_p10)  ;;  %v812_v14 = vld [vmem:[%s4461_s5] sm:$0xff] (!%p352_p10)  ;;  %vm658_vm5 = vcmask (!%p352_p10), 64512   ;;  %v613_v31 = vld [vmem:[%s4459_s3 + $0x18] sm:$0xff] (!%p352_p10) }
  0x14   : > { %3623 = vset.pattern.permute.xlu0 (!%p352_p10), %v3723_v4  ;;  %3624 = vset.pattern.permute.xlu1 (!%p352_p10), %v3723_v4  ;;  %v814_v15 = vld [vmem:[%s4461_s5 + $0x10] sm:$0xff] (!%p352_p10)  ;;  %v816_v16 = vld [vmem:[%s4461_s5 + $0x20] sm:$0xff] (!%p352_p10)  ;;  %v615_v33 = vld [vmem:[%s4459_s3 + $0x28] sm:$0xff] (!%p352_p10)  ;;  %vm860_vm6 = vcmask (!%p352_p10), 523264   ;;  %s3036_s30 = sshll.u32 (!%p352_p10), %s3711_s16, 7  ;;  %s3724_s24 = smov (!%p352_p10), [#allocation2]  }
  0x15   : > { %v437_v5 = vadd.s32 (!%p352_p10), 4, %v433_v3  ;;  %vm434_vm2 = vcmp.eq.s32.totalorder (!%p352_p10), %v3841_v2, %v433_v3  ;;  %625 = vperm.xlu1 (!%p352_p10), %3624, %v611_v10   ;;  %v818_v17 = vld [vmem:[%s4461_s5 + $0x30] sm:$0xff] (!%p352_p10)  ;;  %v1008_v18 = vld [vmem:[%s4463_s7] sm:$0xff] (!%p352_p10)  ;;  %v617_v35 = vld [vmem:[%s4459_s3 + $0x38] sm:$0xff] (!%p352_p10)  ;;  %vm2660_vm7 = vcmp.ge.s32.totalorder (!%p352_p10), %v3841_v2, 4  ;;  %s4405_s22 = scalar_lea.hbm (!%p352_p10), %s4464_s8, %s3036_s30 }
  0x16   : > { %v2848_v7 = vsel (!%p352_p10), %vm434_vm2, 1.0, %v3721_v1  ;;  %v2880_v19 = vld [vmem:[%s4459_s3 + $0x40] sm:$0xff] (!%p352_p10)  ;;  %v2882_v20 = vld [vmem:[%s4459_s3 + $0x50] sm:$0xff] (!%p352_p10)  ;;  %v813_v37 = vld [vmem:[%s4461_s5 + $0x8] sm:$0xff] (!%p352_p10) }
  0x17   : > { %vm438_vm4 = vcmp.eq.s32.totalorder (!%p352_p10), %v3841_v2, %v437_v5  ;;  %v2884_v21 = vld [vmem:[%s4459_s3 + $0x60] sm:$0xff] (!%p352_p10)  ;;  %v2886_v22 = vld [vmem:[%s4459_s3 + $0x70] sm:$0xff] (!%p352_p10)  ;;  %v815_v39 = vld [vmem:[%s4461_s5 + $0x18] sm:$0xff] (!%p352_p10) }
  0x18   : > { %v2849_v8 = vsel (!%p352_p10), %vm438_vm4, 1.0, %v3721_v1  ;;  %v2904_v26 = vld [vmem:[%s4461_s5 + $0x40] sm:$0xff] (!%p352_p10)  ;;  %v2906_v30 = vld [vmem:[%s4461_s5 + $0x50] sm:$0xff] (!%p352_p10)  ;;  %v817_v41 = vld [vmem:[%s4461_s5 + $0x28] sm:$0xff] (!%p352_p10) }
  0x19   : > { %s3839_s27 = scalar_select %p407_p11, %s3711_s16, 1  ;;  %630 = vperm.xlu1 %3624, %v612_v11   ;;  %v610_v27 = vld [vmem:[%s4459_s3] sm:$0xff]  ;;  %v2910_v34 = vld [vmem:[%s4461_s5 + $0x70] sm:$0xff]  ;;  %v819_v43 = vld [vmem:[%s4461_s5 + $0x38] sm:$0xff] }
  0x1a   : > { %v602_v29 = vld [vmem:[%s4458_s2] sm:$0xff]  ;;  %v2922_v36 = vld [vmem:[%s4463_s7 + $0x10] sm:$0xff]  ;;  %v1009_v45 = vld [vmem:[%s4463_s7 + $0x8] sm:$0xff] }
  0x1b   : > { %s2846_s28 = sshll.u32 %s3839_s27, 2  ;;  %v2908_v32 = vld [vmem:[%s4461_s5 + $0x60] sm:$0xff]  ;;  %v2936_v40 = vld [vmem:[%s4459_s3 + $0x90] sm:$0xff]  ;;  %v2881_v47 = vld [vmem:[%s4459_s3 + $0x48] sm:$0xff]  ;;  %s423_s29 = scalar_lea.vmem %s4465_s9, %s3839_s27 }
  0x1c   : > { %s417_s11 = scalar_lea.vmem %s4471_s1, %s2846_s28  ;;  %s413_s20 = scalar_lea.vmem %s4472_s0, %s2846_s28  ;;  %v2934_v38 = vld [vmem:[%s4459_s3 + $0x80] sm:$0xff]  ;;  %v2940_v44 = vld [vmem:[%s4459_s3 + $0xb0] sm:$0xff]  ;;  %v2883_v49 = vld [vmem:[%s4459_s3 + $0x58] sm:$0xff] }
  0x1d   : > { %v442_v6 = vld [vmem:[%s417_s11] sm:$0xf]  ;;  %640 = vperm.xlu1 %3624, %v614_v12   ;;  %v2960_v48 = vld [vmem:[%s4461_s5 + $0x90] sm:$0xff]  ;;  %v2885_v51 = vld [vmem:[%s4459_s3 + $0x68] sm:$0xff]  ;;  %s388_s0 = sand.u32 1, %s3703_s14  }
  0x1e   : > { %3184 = vmatpush3.msk.msra.mxu0 %vm447_vm1, %v442_v6  ;;  %v441_v9 = vld [vmem:[%s413_s20] sm:$0xf]  ;;  %v2964_v52 = vld [vmem:[%s4461_s5 + $0xb0] sm:$0xff]  ;;  %v2887_v53 = vld [vmem:[%s4459_s3 + $0x78] sm:$0xff]  ;;  %s2845_s20 = sshll.u32 %s388_s0, 3  ;;  %s2673_s16 = scalar_lea.sflag [#allocation3], %s388_s0 }
  0x1f   : > { %3186 = vmatmul.mubr.msk.f32.vlgmr.msra.gmra.mrb[0].mxu0 %vm443_vm3, %v2849_v8  ;;  %3189 = vmatpush3.msk.msra.mxu1 %vm447_vm1, %v441_v9  ;;  %v2938_v42 = vld [vmem:[%s4459_s3 + $0xa0] sm:$0xff]  ;;  %v2905_v55 = vld [vmem:[%s4461_s5 + $0x48] sm:$0xff]  ;;  %v2907_v57 = vld [vmem:[%s4461_s5 + $0x58] sm:$0xff]  ;;  %s390_s28 = scalar_lea.vmem [#allocation2], %s2845_s20 }
  0x20   : > { %3191 = vmatmul.mubr.msk.f32.vlgmr.msra.gmra.mrb[0].mxu1 %vm443_vm3, %v2848_v7  ;;  %3195 = vmatprep.mubr.msk.f32.mxu0 %vm658_vm5, %v602_v29  ;;  %v2958_v46 = vld [vmem:[%s4461_s5 + $0x80] sm:$0xff]  ;;  %v2990_v58 = vld [vmem:[%s4459_s3 + $0xd0] sm:$0xff]  ;;  %v2909_v59 = vld [vmem:[%s4461_s5 + $0x68] sm:$0xff]  ;;  %s2699_s11 = sshll.u32 %s390_s28, 4  ;;  %s4407_s11 = int_to_ptr.vmem [resolvable:$true] %s2699_s11 }
  0x21   : > { %650 = vperm.xlu1 %3624, %v616_v13   ;;  %v2962_v50 = vld [vmem:[%s4461_s5 + $0xa0] sm:$0xff]  ;;  %v2911_v61 = vld [vmem:[%s4461_s5 + $0x78] sm:$0xff]  ;;  %v2994_v62 = vld [vmem:[%s4459_s3 + $0xf0] sm:$0xff]  ;;  %s3641_s20 = scalar_lea.vmem %s4407_s11, 128 }
  0x22   : > { %v2976_v54 = vld [vmem:[%s4463_s7 + $0x20] sm:$0xff]  ;;  %v2923_v63 = vld [vmem:[%s4463_s7 + $0x18] sm:$0xff]  ;;  %v2935_v3 = vld [vmem:[%s4459_s3 + $0x88] sm:$0xff]  ;;  %p3642_p12 = scmp.ne.s32.totalorder %s4407_s11, %s3641_s20 }
  0x23   : > { %v2988_v56 = vld [vmem:[%s4459_s3 + $0xc0] sm:$0xff]  ;;  %v3014_v4 = vld [vmem:[%s4461_s5 + $0xd0] sm:$0xff]  ;;  %v2937_v5 = vld [vmem:[%s4459_s3 + $0x98] sm:$0xff] }
  0x24   : > { %v2992_v60 = vld [vmem:[%s4459_s3 + $0xe0] sm:$0xff]  ;;  %v2939_v7 = vld [vmem:[%s4459_s3 + $0xa8] sm:$0xff]  ;;  %v3018_v8 = vld [vmem:[%s4461_s5 + $0xf0] sm:$0xff]  ;;  %p3643_p13 = pnand %p3642_p12, %p3820_p4 }
  0x25   : > { %822 = vperm.xlu1 %3624, %v812_v14   ;;  %v3012_v0 = vld [vmem:[%s4461_s5 + $0xc0] sm:$0xff]  ;;  %v2941_v9 = vld [vmem:[%s4459_s3 + $0xb8] sm:$0xff]  ;;  %v3030_v10 = vld [vmem:[%s4463_s7 + $0x30] sm:$0xff] }
  0x26   : > { %v3016_v6 = vld [vmem:[%s4461_s5 + $0xe0] sm:$0xff]  ;;  %v2959_v11 = vld [vmem:[%s4461_s5 + $0x88] sm:$0xff]  ;;  %v2961_v12 = vld [vmem:[%s4461_s5 + $0x98] sm:$0xff]  ;;  %p3644_p0 = pneg %p3643_p13 }
  0x27   : > { %v2963_v13 = vld [vmem:[%s4461_s5 + $0xa8] sm:$0xff]  ;;  %v2965_v14 = vld [vmem:[%s4461_s5 + $0xb8] sm:$0xff] }
  0x28   : > { %v3019_v29 = vld [vmem:[%s4461_s5 + $0xf8] sm:$0xff] }
  0x29   : > { %832 = vperm.xlu1 %3624, %v814_v15   ;;  %v2977_v15 = vld [vmem:[%s4463_s7 + $0x28] sm:$0xff] }
  0x2d   : > { %842 = vperm.xlu1 %3624, %v816_v16   ;;  %v2989_v16 = vld [vmem:[%s4459_s3 + $0xc8] sm:$0xff] }
  0x31   : > { %852 = vperm.xlu1 %3624, %v818_v17   ;;  %v2991_v17 = vld [vmem:[%s4459_s3 + $0xd8] sm:$0xff] }
  0x35   : > { %1012 = vperm.xlu1 %3624, %v1008_v18   ;;  %v2993_v18 = vld [vmem:[%s4459_s3 + $0xe8] sm:$0xff] }
  0x39   : > { %1133 = vperm.xlu1 %3624, %v2880_v19   ;;  %v2995_v19 = vld [vmem:[%s4459_s3 + $0xf8] sm:$0xff] }
  0x3d   : > { %1143 = vperm.xlu1 %3624, %v2882_v20   ;;  %v3013_v20 = vld [vmem:[%s4461_s5 + $0xc8] sm:$0xff] }
  0x41   : > { %1153 = vperm.xlu1 %3624, %v2884_v21  }
  0x45   : > { %1163 = vperm.xlu1 %3624, %v2886_v22  }
  0x49   : > { %1336 = vperm.xlu1 %3624, %v2904_v26   ;;  %v604_v26 = vld [vmem:[%s4458_s2 + $0x10] sm:$0xff] }
  0x4d   : > { %1346 = vperm.xlu1 %3624, %v2906_v30   ;;  %v607_v30 = vld [vmem:[%s4458_s2 + $0x28] sm:$0xff] }
  0x51   : > { %1356 = vperm.xlu1 %3624, %v2908_v32   ;;  %v3031_v32 = vld [vmem:[%s4463_s7 + $0x38] sm:$0xff] }
  0x55   : > { %1366 = vperm.xlu1 %3624, %v2910_v34   ;;  %v804_v34 = vld [vmem:[%s4460_s4] sm:$0xff] }
  0x56   : > { %3223 = vmatprep.mubr.msk.f32.mxu1 %vm860_vm6, %v804_v34 }
  0x59   : > { %1527 = vperm.xlu1 %3624, %v2922_v36  }
  0x5d   : > { %1648 = vperm.xlu1 %3624, %v2934_v38  }
  0x61   : > { %1658 = vperm.xlu1 %3624, %v2936_v40  }
  0x65   : > { %1668 = vperm.xlu1 %3624, %v2938_v42  }
  0x69   : > { %1678 = vperm.xlu1 %3624, %v2940_v44  }
  0x6d   : > { %1851 = vperm.xlu1 %3624, %v2958_v46  }
  0x71   : > { %1861 = vperm.xlu1 %3624, %v2960_v48  }
  0x75   : > { %1871 = vperm.xlu1 %3624, %v2962_v50  }
  0x79   : > { %1881 = vperm.xlu1 %3624, %v2964_v52  }
  0x7d   : > { %2042 = vperm.xlu1 %3624, %v2976_v54  }
  0x81   : > { %2163 = vperm.xlu1 %3624, %v2988_v56  }
  0x85   : > { %2173 = vperm.xlu1 %3624, %v2990_v58  }
  0x89   : > { %2183 = vperm.xlu1 %3624, %v2992_v60  }
  0x8d   : > { %2193 = vperm.xlu1 %3624, %v2994_v62  }
  0x91   : > { %2366 = vperm.xlu1 %3624, %v3012_v0  }
  0x94   : > { %v626_v36 = vpop.permute.xlu1 %625 }
  0x95   : > { %2376 = vperm.xlu1 %3624, %v3014_v4  }
  0x99   : > { %2386 = vperm.xlu1 %3624, %v3016_v6  }
  0x9d   : > { %2396 = vperm.xlu1 %3624, %v3018_v8  }
  0xa1   : > { %2557 = vperm.xlu1 %3624, %v3030_v10  }
  0xf2   : > { %v517_v23 = vpop.f32.mrb[0].mxu0 }
  0xf3   : > { %523 = vperm.xlu0 %3623, %v517_v23   ;;  %v3187_v24 = vpop.f32.mrb[1].mxu0  ;;  %v3895_v25 = vpop.f32.mrb[0].mxu1  ;;  %v3015_v23 = vld [vmem:[%s4461_s5 + $0xd8] sm:$0xff] }
  0xf4   : > { %v3192_v28 = vpop.f32.mrb[1].mxu1  ;;  %v603_v24 = vld [vmem:[%s4458_s2 + $0x8] sm:$0xff] }
  0xf5   : > { %v606_v28 = vld [vmem:[%s4458_s2 + $0x20] sm:$0xff] }
  0xf7   : > { %620 = vperm.xlu0 %3623, %v610_v27   ;;  %v605_v27 = vld [vmem:[%s4458_s2 + $0x18] sm:$0xff] }
  0xfb   : > { %635 = vperm.xlu0 %3623, %v613_v31   ;;  %v608_v31 = vld [vmem:[%s4458_s2 + $0x30] sm:$0xff] }
  0xff   : > { %645 = vperm.xlu0 %3623, %v615_v33   ;;  %v609_v33 = vld [vmem:[%s4458_s2 + $0x38] sm:$0xff] }
 0x103   : > { %655 = vperm.xlu0 %3623, %v617_v35  }
 0x107   : > { %827 = vperm.xlu0 %3623, %v813_v37  }
 0x10b   : > { %837 = vperm.xlu0 %3623, %v815_v39   ;;  %v631_v39 = vpop.permute.xlu1 %630 }
 0x10f   : > { %847 = vperm.xlu0 %3623, %v817_v41   ;;  %v641_v52 = vpop.permute.xlu1 %640 }
 0x113   : > { %857 = vperm.xlu0 %3623, %v819_v43  }
 0x117   : > { %1017 = vperm.xlu0 %3623, %v1009_v45  }
 0x11b   : > { %1138 = vperm.xlu0 %3623, %v2881_v47  }
 0x11f   : > { %1148 = vperm.xlu0 %3623, %v2883_v49  }
 0x123   : > { %1158 = vperm.xlu0 %3623, %v2885_v51  }
 0x127   : > { %1168 = vperm.xlu0 %3623, %v2887_v53  }
 0x12b   : > { %1341 = vperm.xlu0 %3623, %v2905_v55  }
 0x12f   : > { %1351 = vperm.xlu0 %3623, %v2907_v57  }
 0x133   : > { %1361 = vperm.xlu0 %3623, %v2909_v59  }
 0x137   : > { %1371 = vperm.xlu0 %3623, %v2911_v61  }
 0x13b   : > { %1532 = vperm.xlu0 %3623, %v2923_v63  }
 0x13f   : > { %1653 = vperm.xlu0 %3623, %v2935_v3  }
 0x143   : > { %1663 = vperm.xlu0 %3623, %v2937_v5   ;;  %v651_v5 = vpop.permute.xlu1 %650 }
 0x147   : > { %1673 = vperm.xlu0 %3623, %v2939_v7  }
 0x14b   : > { %1683 = vperm.xlu0 %3623, %v2941_v9  }
 0x14f   : > { %1856 = vperm.xlu0 %3623, %v2959_v11  }
 0x153   : > { %1866 = vperm.xlu0 %3623, %v2961_v12  }
 0x157   : > { %1876 = vperm.xlu0 %3623, %v2963_v13  }
 0x15b   : > { %1886 = vperm.xlu0 %3623, %v2965_v14  }
 0x15f   : > { %2047 = vperm.xlu0 %3623, %v2977_v15  }
 0x163   : > { %2168 = vperm.xlu0 %3623, %v2989_v16  }
 0x167   : > { %2178 = vperm.xlu0 %3623, %v2991_v17   ;;  %v805_v17 = vld [vmem:[%s4460_s4 + $0x8] sm:$0xff] }
 0x16b   : > { %2188 = vperm.xlu0 %3623, %v2993_v18   ;;  %v806_v18 = vld [vmem:[%s4460_s4 + $0x10] sm:$0xff] }
 0x16f   : > { %2198 = vperm.xlu0 %3623, %v2995_v19   ;;  %v807_v19 = vld [vmem:[%s4460_s4 + $0x18] sm:$0xff] }
 0x172   : > { %v524_v21 = vpop.permute.xlu0 %523 }
 0x173   : > { %v4067_v22 = vadd.f32 %v3895_v25, %v524_v21  ;;  %2371 = vperm.xlu0 %3623, %v3013_v20   ;;  %v3017_v25 = vld [vmem:[%s4461_s5 + $0xe8] sm:$0xff]  ;;  %v808_v20 = vld [vmem:[%s4460_s4 + $0x20] sm:$0xff] }
 0x174   : > { %v809_v21 = vld [vmem:[%s4460_s4 + $0x28] sm:$0xff] }
 0x175   : > { %3193 = vmatprep.subr.mxu0 %v4067_v22 }
 0x176   : > { %3194 = vmatpush3.msra.mxu0 %v4067_v22  ;;  %v621_v35 = vpop.permute.xlu0 %620 }
 0x177   : > { %2381 = vperm.xlu0 %3623, %v3015_v23   ;;  %3196 = vmatmul.mubr.msk.f32.vlgmr.msra.gmra.mrb[2].mxu0 %vm658_vm5, %v603_v24  ;;  %v810_v23 = vld [vmem:[%s4460_s4 + $0x30] sm:$0xff]  ;;  %v811_v24 = vld [vmem:[%s4460_s4 + $0x38] sm:$0xff] }
 0x178   : > { %3198 = vmatprep.mubr.msk.f32.mxu0 %vm658_vm5, %v604_v26  ;;  %v1006_v26 = vld [vmem:[%s4462_s6] sm:$0xff] }
 0x17a   : > { %v636_v37 = vpop.permute.xlu0 %635 }
 0x17b   : > { %2391 = vperm.xlu0 %3623, %v3017_v25   ;;  %3199 = vmatmul.mubr.msk.f32.gmra.mrb[4].mxu0 %vm658_vm5, %v605_v27  ;;  %v823_v27 = vpop.permute.xlu1 %822 }
 0x17c   : > { %3201 = vmatprep.mubr.msk.f32.mxu0 %vm658_vm5, %v606_v28 }
 0x17e   : > { %v646_v49 = vpop.permute.xlu0 %645 }
 0x17f   : > { %2401 = vperm.xlu0 %3623, %v3019_v29   ;;  %3202 = vmatmul.mubr.msk.f32.gmra.mrb[6].mxu0 %vm658_vm5, %v607_v30  ;;  %v833_v30 = vpop.permute.xlu1 %832 }
 0x180   : > { %3204 = vmatprep.mubr.msk.f32.mxu0 %vm658_vm5, %v608_v31 }
 0x182   : > { %v656_v63 = vpop.permute.xlu0 %655 }
 0x183   : > { %2562 = vperm.xlu0 %3623, %v3031_v32   ;;  %3205 = vmatmul.mubr.msk.f32.gmra.mrb[8].mxu0 %vm658_vm5, %v609_v33 }
 0x184   : > { %3251 = vmatprep.mubr.msk.f32.mxu0 %vm860_vm6, %v1006_v26  ;;  %v2877_v26 = vld [vmem:[%s4458_s2 + $0x68] sm:$0xff] }
 0x186   : > { %v828_v25 = vpop.permute.xlu0 %827 }
 0x18a   : > { %v838_v28 = vpop.permute.xlu0 %837 }
 0x24a   : > { %v3197_v38 = vpop.f32.mrb[2].mxu0 }
 0x24b   : > { %v755_v40 = vadd.f32 %v3197_v38, %v626_v36  ;;  %v749_v41 = vpop.f32.mrb[3].mxu0 }
 0x24c   : > { %v750_v42 = vadd.f32 %v749_v41, %v621_v35 }
 0x24d   : > { %v789_v43 = vmul.f32 0.01, %v755_v40 }
 0x24e   : > { %v788_v44 = vmul.f32 0.01, %v750_v42  ;;  %v3200_v45 = vpop.f32.mrb[4].mxu0 }
 0x24f   : > { %v797_v46 = vmax.f32 %v755_v40, %v789_v43  ;;  %v765_v47 = vadd.f32 %v3200_v45, %v636_v37  ;;  %v759_v48 = vpop.f32.mrb[5].mxu0  ;;  %v848_v40 = vpop.permute.xlu0 %847 }
 0x250   : > { %v796_v50 = vmax.f32 %v750_v42, %v788_v44  ;;  %v760_v51 = vadd.f32 %v759_v48, %v631_v39  ;;  %v843_v43 = vpop.permute.xlu1 %842 }
 0x251   : > { %v791_v53 = vmul.f32 0.01, %v765_v47 }
 0x252   : > { %v790_v54 = vmul.f32 0.01, %v760_v51  ;;  %v3203_v55 = vpop.f32.mrb[6].mxu0  ;;  %v3437_v56 = vpack.c.bf16 %v797_v46, %v796_v50 }
 0x253   : > { %v799_v57 = vmax.f32 %v765_v47, %v791_v53  ;;  %v775_v58 = vadd.f32 %v3203_v55, %v646_v49  ;;  %v769_v59 = vpop.f32.mrb[7].mxu0 }
 0x254   : > { %v798_v60 = vmax.f32 %v760_v51, %v790_v54  ;;  %v770_v61 = vadd.f32 %v769_v59, %v641_v52  ;;  %3438 = vmatprep.subr.bf16.mxu1 %v3437_v56  ;;  %v858_v54 = vpop.permute.xlu0 %857 }
 0x255   : > { %v793_v62 = vmul.f32 0.01, %v775_v58  ;;  %3440 = vmatpush3.bf16.msra.mxu1 %v3437_v56 }
 0x256   : > { %v792_v0 = vmul.f32 0.01, %v770_v61  ;;  %v3206_v3 = vpop.f32.mrb[8].mxu0  ;;  %v3441_v4 = vpack.c.bf16 %v799_v57, %v798_v60 }
 0x257   : > { %v801_v6 = vmax.f32 %v775_v58, %v793_v62  ;;  %v785_v7 = vadd.f32 %v3206_v3, %v656_v63  ;;  %v779_v8 = vpop.f32.mrb[9].mxu0  ;;  %v853_v58 = vpop.permute.xlu1 %852 }
 0x258   : > { %v800_v9 = vmax.f32 %v770_v61, %v792_v0  ;;  %v780_v10 = vadd.f32 %v779_v8, %v651_v5  ;;  %3442 = vmatprep.subr.bf16.mxu1 %v3441_v4  ;;  %v1007_v8 = vld [vmem:[%s4462_s6 + $0x8] sm:$0xff] }
 0x259   : > { %v795_v11 = vmul.f32 0.01, %v785_v7  ;;  %3444 = vmatpush3.bf16.msra.mxu1 %v3441_v4 }
 0x25a   : > { %v794_v12 = vmul.f32 0.01, %v780_v10  ;;  %v3445_v13 = vpack.c.bf16 %v801_v6, %v800_v9  ;;  %v2872_v9 = vld [vmem:[%s4458_s2 + $0x40] sm:$0xff] }
 0x25b   : > { %v803_v14 = vmax.f32 %v785_v7, %v795_v11  ;;  %v1013_v11 = vpop.permute.xlu1 %1012 }
 0x25c   : > { %v802_v15 = vmax.f32 %v780_v10, %v794_v12  ;;  %3446 = vmatprep.subr.bf16.mxu1 %v3445_v13 }
 0x25d   : > { %3448 = vmatpush3.bf16.msra.mxu1 %v3445_v13 }
 0x25e   : > { %v3449_v16 = vpack.c.bf16 %v803_v14, %v802_v15 }
 0x260   : > { %3450 = vmatprep.subr.bf16.mxu1 %v3449_v16 }
 0x261   : > { %3452 = vmatpush3.bf16.msra.mxu1 %v3449_v16 }
 0x264   : > { %3224 = vmatmul.mubr.msk.f32.vlgmr.msra.gmra.mrb[2].mxu1 %vm860_vm6, %v805_v17  ;;  %v1018_v17 = vpop.permute.xlu0 %1017 }
 0x265   : > { %3226 = vmatprep.mubr.msk.f32.mxu1 %vm860_vm6, %v806_v18 }
 0x268   : > { %3227 = vmatmul.mubr.msk.f32.gmra.mrb[4].mxu1 %vm860_vm6, %v807_v19 }
 0x269   : > { %3229 = vmatprep.mubr.msk.f32.mxu1 %vm860_vm6, %v808_v20 }
 0x26c   : > { %3230 = vmatmul.mubr.msk.f32.gmra.mrb[6].mxu1 %vm860_vm6, %v809_v21  ;;  %v2873_v21 = vld [vmem:[%s4458_s2 + $0x48] sm:$0xff] }
 0x26d   : > { %3232 = vmatprep.mubr.msk.f32.mxu1 %vm860_vm6, %v810_v23  ;;  %v2874_v23 = vld [vmem:[%s4458_s2 + $0x50] sm:$0xff] }
 0x270   : > { %3233 = vmatmul.mubr.msk.f32.gmra.mrb[8].mxu1 %vm860_vm6, %v811_v24  ;;  %v2876_v24 = vld [vmem:[%s4458_s2 + $0x60] sm:$0xff] }
 0x337   : > { %v3225_v29 = vpop.f32.mrb[2].mxu1 }
 0x338   : > { %v957_v31 = vadd.f32 %v3225_v29, %v828_v25  ;;  %v951_v32 = vpop.f32.mrb[3].mxu1  ;;  %v2878_v25 = vld [vmem:[%s4458_s2 + $0x70] sm:$0xff]  ;;  %v1139_v29 = vpop.permute.xlu0 %1138 }
 0x339   : > { %v952_v33 = vadd.f32 %v951_v32, %v823_v27  ;;  %v2879_v27 = vld [vmem:[%s4458_s2 + $0x78] sm:$0xff] }
 0x33a   : > { %v991_v34 = vmul.f32 0.01, %v957_v31 }
 0x33b   : > { %v990_v35 = vmul.f32 0.01, %v952_v33  ;;  %v3228_v36 = vpop.f32.mrb[4].mxu1 }
 0x33c   : > { %v999_v37 = vmax.f32 %v957_v31, %v991_v34  ;;  %v967_v38 = vadd.f32 %v3228_v36, %v838_v28  ;;  %v961_v39 = vpop.f32.mrb[5].mxu1  ;;  %v2896_v28 = vld [vmem:[%s4460_s4 + $0x40] sm:$0xff]  ;;  %v1149_v31 = vpop.permute.xlu0 %1148 }
 0x33d   : > { %v998_v41 = vmax.f32 %v952_v33, %v990_v35  ;;  %v962_v42 = vadd.f32 %v961_v39, %v833_v30  ;;  %3284 = vmatprep.mubr.msk.f32.mxu1 %vm860_vm6, %v2896_v28  ;;  %v1134_v30 = vpop.permute.xlu1 %1133 }
 0x33e   : > { %v993_v44 = vmul.f32 0.01, %v967_v38 }
 0x33f   : > { %v992_v45 = vmul.f32 0.01, %v962_v42  ;;  %v3231_v46 = vpop.f32.mrb[6].mxu1  ;;  %v3453_v47 = vpack.c.bf16 %v999_v37, %v998_v41 }
 0x340   : > { %v1001_v48 = vmax.f32 %v967_v38, %v993_v44  ;;  %v977_v49 = vadd.f32 %v3231_v46, %v848_v40  ;;  %v971_v50 = vpop.f32.mrb[7].mxu1 }
 0x341   : > { %v1000_v51 = vmax.f32 %v962_v42, %v992_v45  ;;  %v972_v52 = vadd.f32 %v971_v50, %v843_v43  ;;  %3454 = vmatprep.subr.bf16.mxu0 %v3453_v47  ;;  %v1144_v33 = vpop.permute.xlu1 %1143  ;;  %v1159_v43 = vpop.permute.xlu0 %1158 }
 0x342   : > { %v995_v53 = vmul.f32 0.01, %v977_v49  ;;  %3456 = vmatpush3.bf16.msra.mxu0 %v3453_v47 }
 0x343   : > { %v994_v55 = vmul.f32 0.01, %v972_v52  ;;  %v3234_v56 = vpop.f32.mrb[8].mxu1  ;;  %v3457_v57 = vpack.c.bf16 %v1001_v48, %v1000_v51 }
 0x344   : > { %v1003_v59 = vmax.f32 %v977_v49, %v995_v53  ;;  %v987_v60 = vadd.f32 %v3234_v56, %v858_v54  ;;  %v981_v61 = vpop.f32.mrb[9].mxu1 }
 0x345   : > { %v1002_v62 = vmax.f32 %v972_v52, %v994_v55  ;;  %v982_v63 = vadd.f32 %v981_v61, %v853_v58  ;;  %3458 = vmatprep.subr.bf16.mxu0 %v3457_v57  ;;  %v1154_v46 = vpop.permute.xlu1 %1153 }
 0x346   : > { %v997_v0 = vmul.f32 0.01, %v987_v60  ;;  %3460 = vmatpush3.bf16.msra.mxu0 %v3457_v57  ;;  %v1169_v57 = vpop.permute.xlu0 %1168 }
 0x347   : > { %v996_v3 = vmul.f32 0.01, %v982_v63  ;;  %v3461_v4 = vpack.c.bf16 %v1003_v59, %v1002_v62 }
 0x348   : > { %v1005_v5 = vmax.f32 %v987_v60, %v997_v0 }
 0x349   : > { %v1004_v6 = vmax.f32 %v982_v63, %v996_v3  ;;  %3462 = vmatprep.subr.bf16.mxu0 %v3461_v4  ;;  %v1164_v61 = vpop.permute.xlu1 %1163 }
 0x34a   : > { %3464 = vmatpush3.bf16.msra.mxu0 %v3461_v4 }
 0x34b   : > { %v3465_v7 = vpack.c.bf16 %v1005_v5, %v1004_v6 }
 0x34d   : > { %3466 = vmatprep.subr.bf16.mxu0 %v3465_v7 }
 0x34e   : > { %3468 = vmatpush3.bf16.msra.mxu0 %v3465_v7 }
 0x351   : > { %3252 = vmatmul.mubr.msk.f32.vlgmr.msra.gmra.mrb[10].mxu0 %vm860_vm6, %v1007_v8 }
 0x352   : > { %3256 = vmatprep.mubr.msk.f32.mxu0 %vm658_vm5, %v2872_v9 }
 0x424   : > { %v3253_v10 = vpop.f32.mrb[10].mxu0 }
 0x425   : > { %v1092_v12 = vpop.f32.mrb[11].mxu0  ;;  %v1098_v18 = vadd.f32 %v3253_v10, %v1018_v17  ;;  %v2902_v17 = vld [vmem:[%s4460_s4 + $0x70] sm:$0xff] }
 0x426   : > { %v1093_v13 = vadd.f32 %v1092_v12, %v1013_v11  ;;  %v2897_v11 = vld [vmem:[%s4460_s4 + $0x48] sm:$0xff]  ;;  %v2898_v12 = vld [vmem:[%s4460_s4 + $0x50] sm:$0xff] }
 0x428   : > { %3625 = vtanh.f32 %v1093_v13  ;;  %v2899_v13 = vld [vmem:[%s4460_s4 + $0x58] sm:$0xff] }
 0x432   : > { %v4155_v14 = vpop.eup %3625 }
 0x433   : > { %v1102_v15 = vmul.f32 1.442695, %v4155_v14 }
 0x435   : > { %3627 = vpow2.f32 %v1102_v15  ;;  %v2900_v15 = vld [vmem:[%s4460_s4 + $0x60] sm:$0xff] }
 0x43f   : > { %v3628_v16 = vpop.eup %3627 }
 0x440   : > { %v1104_v19 = vmul.f32 %v3628_v16, %v4067_v22  ;;  %v2875_v22 = vld [vmem:[%s4458_s2 + $0x58] sm:$0xff]  ;;  %v2901_v16 = vld [vmem:[%s4460_s4 + $0x68] sm:$0xff] }
 0x442   : > { %v4159_v20 = vadd.f32 %v1104_v19, %v1098_v18  ;;  %v2903_v18 = vld [vmem:[%s4460_s4 + $0x78] sm:$0xff]  ;;  %v2920_v19 = vld [vmem:[%s4462_s6 + $0x10] sm:$0xff] }
 0x444   : > { %3254 = vmatprep.subr.mxu0 %v4159_v20 }
 0x445   : > { %3255 = vmatpush3.msra.mxu0 %v4159_v20 }
 0x446   : > { %3257 = vmatmul.mubr.msk.f32.vlgmr.msra.gmra.mrb[12].mxu0 %vm658_vm5, %v2873_v21  ;;  %v1342_v21 = vpop.permute.xlu0 %1341 }
 0x447   : > { %3259 = vmatprep.mubr.msk.f32.mxu0 %vm658_vm5, %v2874_v23  ;;  %v1337_v23 = vpop.permute.xlu1 %1336 }
 0x44a   : > { %3260 = vmatmul.mubr.msk.f32.gmra.mrb[14].mxu0 %vm658_vm5, %v2875_v22  ;;  %v1352_v22 = vpop.permute.xlu0 %1351 }
 0x44b   : > { %3262 = vmatprep.mubr.msk.f32.mxu0 %vm658_vm5, %v2876_v24 }
 0x44e   : > { %3263 = vmatmul.mubr.msk.f32.gmra.mrb[16].mxu0 %vm658_vm5, %v2877_v26  ;;  %v1347_v26 = vpop.permute.xlu1 %1346 }
 0x44f   : > { %3265 = vmatprep.mubr.msk.f32.mxu0 %vm658_vm5, %v2878_v25 }
 0x452   : > { %3266 = vmatmul.mubr.msk.f32.gmra.mrb[18].mxu0 %vm658_vm5, %v2879_v27 }
 0x453   : > { %3312 = vmatprep.mubr.msk.f32.mxu0 %vm860_vm6, %v2920_v19 }
 0x519   : > { %v3258_v32 = vpop.f32.mrb[12].mxu0 }
 0x51a   : > { %v1267_v34 = vadd.f32 %v3258_v32, %v1139_v29  ;;  %v1261_v35 = vpop.f32.mrb[13].mxu0 }
 0x51b   : > { %v1262_v36 = vadd.f32 %v1261_v35, %v1134_v30  ;;  %v1362_v35 = vpop.permute.xlu0 %1361 }
 0x51c   : > { %v1301_v37 = vmul.f32 0.01, %v1267_v34 }
 0x51d   : > { %v1300_v38 = vmul.f32 0.01, %v1262_v36  ;;  %v3261_v39 = vpop.f32.mrb[14].mxu0 }
 0x51e   : > { %v1309_v40 = vmax.f32 %v1267_v34, %v1301_v37  ;;  %v1277_v41 = vadd.f32 %v3261_v39, %v1149_v31  ;;  %v1271_v42 = vpop.f32.mrb[15].mxu0 }
 0x51f   : > { %v1308_v44 = vmax.f32 %v1262_v36, %v1300_v38  ;;  %v1272_v45 = vadd.f32 %v1271_v42, %v1144_v33  ;;  %v1357_v38 = vpop.permute.xlu1 %1356 }
 0x520   : > { %v1303_v47 = vmul.f32 0.01, %v1277_v41 }
 0x521   : > { %v1302_v48 = vmul.f32 0.01, %v1272_v45  ;;  %v3264_v49 = vpop.f32.mrb[16].mxu0  ;;  %v3469_v50 = vpack.c.bf16 %v1309_v40, %v1308_v44 }
 0x522   : > { %v1311_v51 = vmax.f32 %v1277_v41, %v1303_v47  ;;  %v1287_v52 = vadd.f32 %v3264_v49, %v1159_v43  ;;  %v1281_v53 = vpop.f32.mrb[17].mxu0  ;;  %v1372_v49 = vpop.permute.xlu0 %1371 }
 0x523   : > { %v1310_v54 = vmax.f32 %v1272_v45, %v1302_v48  ;;  %v1282_v55 = vadd.f32 %v1281_v53, %v1154_v46  ;;  %3470 = vmatprep.subr.bf16.mxu1 %v3469_v50  ;;  %v1367_v53 = vpop.permute.xlu1 %1366 }
 0x524   : > { %v1305_v56 = vmul.f32 0.01, %v1287_v52  ;;  %3472 = vmatpush3.bf16.msra.mxu1 %v3469_v50 }
 0x525   : > { %v1304_v58 = vmul.f32 0.01, %v1282_v55  ;;  %v3267_v59 = vpop.f32.mrb[18].mxu0  ;;  %v3473_v60 = vpack.c.bf16 %v1311_v51, %v1310_v54 }
 0x526   : > { %v1313_v62 = vmax.f32 %v1287_v52, %v1305_v56  ;;  %v1297_v63 = vadd.f32 %v3267_v59, %v1169_v57  ;;  %v1291_v0 = vpop.f32.mrb[19].mxu0 }
 0x527   : > { %v1312_v3 = vmax.f32 %v1282_v55, %v1304_v58  ;;  %v1292_v4 = vadd.f32 %v1291_v0, %v1164_v61  ;;  %3474 = vmatprep.subr.bf16.mxu1 %v3473_v60 }
 0x528   : > { %v1307_v5 = vmul.f32 0.01, %v1297_v63  ;;  %3476 = vmatpush3.bf16.msra.mxu1 %v3473_v60 }
 0x529   : > { %v1306_v6 = vmul.f32 0.01, %v1292_v4  ;;  %v3477_v7 = vpack.c.bf16 %v1313_v62, %v1312_v3  ;;  %v2921_v3 = vld [vmem:[%s4462_s6 + $0x18] sm:$0xff] }
 0x52a   : > { %v1315_v8 = vmax.f32 %v1297_v63, %v1307_v5 }
 0x52b   : > { %v1314_v9 = vmax.f32 %v1292_v4, %v1306_v6  ;;  %3478 = vmatprep.subr.bf16.mxu1 %v3477_v7  ;;  %v2926_v4 = vld [vmem:[%s4458_s2 + $0x80] sm:$0xff]  ;;  %v1528_v6 = vpop.permute.xlu1 %1527 }
 0x52c   : > { %3480 = vmatpush3.bf16.msra.mxu1 %v3477_v7 }
 0x52d   : > { %v3481_v10 = vpack.c.bf16 %v1315_v8, %v1314_v9  ;;  %v1106_v9 = vrot.slane %v4155_v14, 4 }
 0x52f   : > { %3482 = vmatprep.subr.bf16.mxu1 %v3481_v10 }
 0x530   : > { %3484 = vmatpush3.bf16.msra.mxu1 %v3481_v10  ;;  %v1107_v10 = vadd.f32 %v4155_v14, %v1106_v9 }
 0x533   : > { %3285 = vmatmul.mubr.msk.f32.vlgmr.msra.gmra.mrb[10].mxu1 %vm860_vm6, %v2897_v11  ;;  %v1108_v11 = vrot.slane %v1107_v10, 2 }
 0x534   : > { %3287 = vmatprep.mubr.msk.f32.mxu1 %vm860_vm6, %v2898_v12 }
 0x537   : > { %3288 = vmatmul.mubr.msk.f32.gmra.mrb[12].mxu1 %vm860_vm6, %v2899_v13 }
 0x538   : > { %3290 = vmatprep.mubr.msk.f32.mxu1 %vm860_vm6, %v2900_v15 }
 0x53b   : > { %3291 = vmatmul.mubr.msk.f32.gmra.mrb[14].mxu1 %vm860_vm6, %v2901_v16  ;;  %v1109_v16 = vadd.f32 %v1108_v11, %v1107_v10 }
 0x53c   : > { %3293 = vmatprep.mubr.msk.f32.mxu1 %vm860_vm6, %v2902_v17 }
 0x53d   : > { %v1110_v19 = vrot.slane %v1109_v16, 1 }
 0x53f   : > { %3294 = vmatmul.mubr.msk.f32.gmra.mrb[16].mxu1 %vm860_vm6, %v2903_v18 }
 0x606   : > { %v3286_v24 = vpop.f32.mrb[10].mxu1 }
 0x607   : > { %v1470_v25 = vadd.f32 %v3286_v24, %v1342_v21  ;;  %v1464_v27 = vpop.f32.mrb[11].mxu1 }
 0x608   : > { %v1465_v28 = vadd.f32 %v1464_v27, %v1337_v23 }
 0x609   : > { %v1504_v29 = vmul.f32 0.01, %v1470_v25 }
 0x60a   : > { %v1503_v30 = vmul.f32 0.01, %v1465_v28  ;;  %v3289_v31 = vpop.f32.mrb[12].mxu1 }
 0x60b   : > { %v1512_v32 = vmax.f32 %v1470_v25, %v1504_v29  ;;  %v1480_v33 = vadd.f32 %v3289_v31, %v1352_v22  ;;  %v1474_v34 = vpop.f32.mrb[13].mxu1  ;;  %v1111_v22 = vadd.f32 %v1110_v19, %v1109_v16  ;;  %v1533_v25 = vpop.permute.xlu0 %1532  ;;  %v2928_v31 = vld [vmem:[%s4458_s2 + $0x90] sm:$0xff] }
 0x60c   : > { %v1511_v36 = vmax.f32 %v1465_v28, %v1503_v30  ;;  %v1475_v37 = vadd.f32 %v1474_v34, %v1347_v26  ;;  %v2927_v30 = vld [vmem:[%s4458_s2 + $0x88] sm:$0xff]  ;;  %v2932_v34 = vld [vmem:[%s4458_s2 + $0xb0] sm:$0xff] }
 0x60d   : > { %v1506_v39 = vmul.f32 0.01, %v1480_v33 }
 0x60e   : > { %v1505_v40 = vmul.f32 0.01, %v1475_v37  ;;  %v3292_v41 = vpop.f32.mrb[14].mxu1  ;;  %v3485_v42 = vpack.c.bf16 %v1512_v32, %v1511_v36  ;;  %v2930_v32 = vld [vmem:[%s4458_s2 + $0xa0] sm:$0xff] }
 0x60f   : > { %v1514_v43 = vmax.f32 %v1480_v33, %v1506_v39  ;;  %v1490_v44 = vadd.f32 %v3292_v41, %v1362_v35  ;;  %v1484_v45 = vpop.f32.mrb[15].mxu1  ;;  %v2931_v33 = vld [vmem:[%s4458_s2 + $0xa8] sm:$0xff]  ;;  %v2933_v35 = vld [vmem:[%s4458_s2 + $0xb8] sm:$0xff]  ;;  %v2950_v36 = vld [vmem:[%s4460_s4 + $0x80] sm:$0xff] }
 0x610   : > { %v1513_v46 = vmax.f32 %v1475_v37, %v1505_v40  ;;  %v1485_v47 = vadd.f32 %v1484_v45, %v1357_v38  ;;  %3486 = vmatprep.subr.bf16.mxu0 %v3485_v42  ;;  %3345 = vmatprep.mubr.msk.f32.mxu1 %vm860_vm6, %v2950_v36  ;;  %v1654_v37 = vpop.permute.xlu0 %1653  ;;  %v1649_v38 = vpop.permute.xlu1 %1648 }
 0x611   : > { %v1508_v48 = vmul.f32 0.01, %v1490_v44  ;;  %3488 = vmatpush3.bf16.msra.mxu0 %v3485_v42 }
 0x612   : > { %v1507_v50 = vmul.f32 0.01, %v1485_v47  ;;  %v3295_v51 = vpop.f32.mrb[16].mxu1  ;;  %v3489_v52 = vpack.c.bf16 %v1514_v43, %v1513_v46 }
 0x613   : > { %v1516_v54 = vmax.f32 %v1490_v44, %v1508_v48  ;;  %v1500_v55 = vadd.f32 %v3295_v51, %v1372_v49  ;;  %v1494_v56 = vpop.f32.mrb[17].mxu1 }
 0x614   : > { %v1515_v57 = vmax.f32 %v1485_v47, %v1507_v50  ;;  %v1495_v58 = vadd.f32 %v1494_v56, %v1367_v53  ;;  %3490 = vmatprep.subr.bf16.mxu0 %v3489_v52  ;;  %v1664_v39 = vpop.permute.xlu0 %1663  ;;  %v1659_v41 = vpop.permute.xlu1 %1658 }
 0x615   : > { %v1510_v59 = vmul.f32 0.01, %v1500_v55  ;;  %3492 = vmatpush3.bf16.msra.mxu0 %v3489_v52 }
 0x616   : > { %v1509_v60 = vmul.f32 0.01, %v1495_v58  ;;  %v3493_v61 = vpack.c.bf16 %v1516_v54, %v1515_v57 }
 0x617   : > { %v1518_v62 = vmax.f32 %v1500_v55, %v1510_v59 }
 0x618   : > { %v1517_v63 = vmax.f32 %v1495_v58, %v1509_v60  ;;  %3494 = vmatprep.subr.bf16.mxu0 %v3493_v61  ;;  %v1674_v51 = vpop.permute.xlu0 %1673  ;;  %v1669_v54 = vpop.permute.xlu1 %1668 }
 0x619   : > { %3496 = vmatpush3.bf16.msra.mxu0 %v3493_v61 }
 0x61a   : > { %v3497_v0 = vpack.c.bf16 %v1518_v62, %v1517_v63 }
 0x61c   : > { %3498 = vmatprep.subr.bf16.mxu0 %v3497_v0 }
 0x61d   : > { %3500 = vmatpush3.bf16.msra.mxu0 %v3497_v0 }
 0x620   : > { %3313 = vmatmul.mubr.msk.f32.vlgmr.msra.gmra.mrb[20].mxu0 %vm860_vm6, %v2921_v3  ;;  %v1684_v3 = vpop.permute.xlu0 %1683 }
 0x621   : > { %3317 = vmatprep.mubr.msk.f32.mxu0 %vm658_vm5, %v2926_v4 }
 0x6f3   : > { %v3314_v5 = vpop.f32.mrb[20].mxu0 }
 0x6f4   : > { %v1607_v7 = vpop.f32.mrb[21].mxu0  ;;  %v1613_v28 = vadd.f32 %v3314_v5, %v1533_v25  ;;  %v2956_v25 = vld [vmem:[%s4460_s4 + $0xb0] sm:$0xff] }
 0x6f5   : > { %v1608_v8 = vadd.f32 %v1607_v7, %v1528_v6  ;;  %v1679_v7 = vpop.permute.xlu1 %1678 }
 0x6f7   : > { %3629 = vtanh.f32 %v1608_v8 }
 0x701   : > { %v3630_v12 = vpop.eup %3629 }
 0x702   : > { %v1621_v13 = vrot.slane %v3630_v12, 4  ;;  %v1617_v15 = vmul.f32 1.442695, %v3630_v12 }
 0x704   : > { %v1622_v17 = vadd.f32 %v3630_v12, %v1621_v13  ;;  %3631 = vpow2.f32 %v1617_v15 }
 0x706   : > { %v1623_v18 = vrot.slane %v1622_v17, 2 }
 0x708   : > { %v1624_v21 = vadd.f32 %v1623_v18, %v1622_v17 }
 0x70a   : > { %v1625_v23 = vrot.slane %v1624_v21, 1 }
 0x70c   : > { %v1626_v24 = vadd.f32 %v1625_v23, %v1624_v21  ;;  %v2951_v21 = vld [vmem:[%s4460_s4 + $0x88] sm:$0xff]  ;;  %v2952_v23 = vld [vmem:[%s4460_s4 + $0x90] sm:$0xff] }
 0x70e   : > { %v3632_v26 = vpop.eup %3631  ;;  %v4237_v27 = vadd.f32 %v1626_v24, %v1111_v22  ;;  %v2953_v22 = vld [vmem:[%s4460_s4 + $0x98] sm:$0xff]  ;;  %v2954_v24 = vld [vmem:[%s4460_s4 + $0xa0] sm:$0xff] }
 0x70f   : > { %v1619_v14 = vmul.f32 %v3632_v26, %v4159_v20  ;;  %v2929_v20 = vld [vmem:[%s4458_s2 + $0x98] sm:$0xff]  ;;  %v2955_v26 = vld [vmem:[%s4460_s4 + $0xa8] sm:$0xff] }
 0x711   : > { %v4240_v29 = vadd.f32 %v1619_v14, %v1613_v28  ;;  %v2957_v28 = vld [vmem:[%s4460_s4 + $0xb8] sm:$0xff]  ;;  %v2974_v14 = vld [vmem:[%s4462_s6 + $0x20] sm:$0xff] }
 0x713   : > { %3315 = vmatprep.subr.mxu0 %v4240_v29 }
 0x714   : > { %3316 = vmatpush3.msra.mxu0 %v4240_v29 }
 0x715   : > { %3318 = vmatmul.mubr.msk.f32.vlgmr.msra.gmra.mrb[22].mxu0 %vm658_vm5, %v2927_v30  ;;  %v1857_v30 = vpop.permute.xlu0 %1856 }
 0x716   : > { %3320 = vmatprep.mubr.msk.f32.mxu0 %vm658_vm5, %v2928_v31  ;;  %v1852_v31 = vpop.permute.xlu1 %1851 }
 0x719   : > { %3321 = vmatmul.mubr.msk.f32.gmra.mrb[24].mxu0 %vm658_vm5, %v2929_v20  ;;  %v1867_v20 = vpop.permute.xlu0 %1866 }
 0x71a   : > { %3323 = vmatprep.mubr.msk.f32.mxu0 %vm658_vm5, %v2930_v32 }
 0x71d   : > { %3324 = vmatmul.mubr.msk.f32.gmra.mrb[26].mxu0 %vm658_vm5, %v2931_v33  ;;  %v1862_v33 = vpop.permute.xlu1 %1861 }
 0x71e   : > { %3326 = vmatprep.mubr.msk.f32.mxu0 %vm658_vm5, %v2932_v34 }
 0x721   : > { %3327 = vmatmul.mubr.msk.f32.gmra.mrb[28].mxu0 %vm658_vm5, %v2933_v35 }
 0x722   : > { %3373 = vmatprep.mubr.msk.f32.mxu0 %vm860_vm6, %v2974_v14 }
 0x7e8   : > { %v3319_v40 = vpop.f32.mrb[22].mxu0 }
 0x7e9   : > { %v1782_v42 = vadd.f32 %v3319_v40, %v1654_v37  ;;  %v1776_v43 = vpop.f32.mrb[23].mxu0 }
 0x7ea   : > { %v1777_v44 = vadd.f32 %v1776_v43, %v1649_v38  ;;  %v1877_v43 = vpop.permute.xlu0 %1876 }
 0x7eb   : > { %v1816_v45 = vmul.f32 0.01, %v1782_v42 }
 0x7ec   : > { %v1815_v46 = vmul.f32 0.01, %v1777_v44  ;;  %v3322_v47 = vpop.f32.mrb[24].mxu0 }
 0x7ed   : > { %v1824_v48 = vmax.f32 %v1782_v42, %v1816_v45  ;;  %v1792_v49 = vadd.f32 %v3322_v47, %v1664_v39  ;;  %v1786_v50 = vpop.f32.mrb[25].mxu0 }
 0x7ee   : > { %v1823_v52 = vmax.f32 %v1777_v44, %v1815_v46  ;;  %v1787_v53 = vadd.f32 %v1786_v50, %v1659_v41  ;;  %v1872_v46 = vpop.permute.xlu1 %1871 }
 0x7ef   : > { %v1818_v55 = vmul.f32 0.01, %v1792_v49 }
 0x7f0   : > { %v1817_v56 = vmul.f32 0.01, %v1787_v53  ;;  %v3325_v57 = vpop.f32.mrb[26].mxu0  ;;  %v3501_v58 = vpack.c.bf16 %v1824_v48, %v1823_v52 }
 0x7f1   : > { %v1826_v59 = vmax.f32 %v1792_v49, %v1818_v55  ;;  %v1802_v60 = vadd.f32 %v3325_v57, %v1674_v51  ;;  %v1796_v61 = vpop.f32.mrb[27].mxu0  ;;  %v1887_v57 = vpop.permute.xlu0 %1886 }
 0x7f2   : > { %v1825_v62 = vmax.f32 %v1787_v53, %v1817_v56  ;;  %v1797_v63 = vadd.f32 %v1796_v61, %v1669_v54  ;;  %3502 = vmatprep.subr.bf16.mxu1 %v3501_v58  ;;  %v1882_v61 = vpop.permute.xlu1 %1881 }
 0x7f3   : > { %v1820_v0 = vmul.f32 0.01, %v1802_v60  ;;  %3504 = vmatpush3.bf16.msra.mxu1 %v3501_v58 }
 0x7f4   : > { %v1819_v4 = vmul.f32 0.01, %v1797_v63  ;;  %v3328_v5 = vpop.f32.mrb[28].mxu0  ;;  %v3505_v6 = vpack.c.bf16 %v1826_v59, %v1825_v62 }
 0x7f5   : > { %v1828_v8 = vmax.f32 %v1802_v60, %v1820_v0  ;;  %v1812_v9 = vadd.f32 %v3328_v5, %v1684_v3  ;;  %v1806_v10 = vpop.f32.mrb[29].mxu0  ;;  %v2048_v14 = vpop.permute.xlu0 %2047 }
 0x7f6   : > { %v1827_v11 = vmax.f32 %v1797_v63, %v1819_v4  ;;  %v1807_v12 = vadd.f32 %v1806_v10, %v1679_v7  ;;  %3506 = vmatprep.subr.bf16.mxu1 %v3505_v6 }
 0x7f7   : > { %v1822_v13 = vmul.f32 0.01, %v1812_v9  ;;  %3508 = vmatpush3.bf16.msra.mxu1 %v3505_v6 }
 0x7f8   : > { %v1821_v15 = vmul.f32 0.01, %v1807_v12  ;;  %v3509_v16 = vpack.c.bf16 %v1828_v8, %v1827_v11  ;;  %v2975_v11 = vld [vmem:[%s4462_s6 + $0x28] sm:$0xff] }
 0x7f9   : > { %v1830_v17 = vmax.f32 %v1812_v9, %v1822_v13 }
 0x7fa   : > { %v1829_v18 = vmax.f32 %v1807_v12, %v1821_v15  ;;  %3510 = vmatprep.subr.bf16.mxu1 %v3509_v16  ;;  %v2980_v12 = vld [vmem:[%s4458_s2 + $0xc0] sm:$0xff]  ;;  %v2043_v15 = vpop.permute.xlu1 %2042 }
 0x7fb   : > { %3512 = vmatpush3.bf16.msra.mxu1 %v3509_v16 }
 0x7fc   : > { %v3513_v19 = vpack.c.bf16 %v1830_v17, %v1829_v18 }
 0x7fe   : > { %3514 = vmatprep.subr.bf16.mxu1 %v3513_v19 }
 0x7ff   : > { %3516 = vmatpush3.bf16.msra.mxu1 %v3513_v19 }
 0x802   : > { %3346 = vmatmul.mubr.msk.f32.vlgmr.msra.gmra.mrb[18].mxu1 %vm860_vm6, %v2951_v21 }
 0x803   : > { %3348 = vmatprep.mubr.msk.f32.mxu1 %vm860_vm6, %v2952_v23 }
 0x806   : > { %3349 = vmatmul.mubr.msk.f32.gmra.mrb[20].mxu1 %vm860_vm6, %v2953_v22 }
 0x807   : > { %3351 = vmatprep.mubr.msk.f32.mxu1 %vm860_vm6, %v2954_v24 }
 0x80a   : > { %3352 = vmatmul.mubr.msk.f32.gmra.mrb[22].mxu1 %vm860_vm6, %v2955_v26 }
 0x80b   : > { %3354 = vmatprep.mubr.msk.f32.mxu1 %vm860_vm6, %v2956_v25 }
 0x80e   : > { %3355 = vmatmul.mubr.msk.f32.gmra.mrb[24].mxu1 %vm860_vm6, %v2957_v28 }
 0x8d5   : > { %v3347_v32 = vpop.f32.mrb[18].mxu1 }
 0x8d6   : > { %v1985_v34 = vadd.f32 %v3347_v32, %v1857_v30  ;;  %v1979_v35 = vpop.f32.mrb[19].mxu1 }
 0x8d7   : > { %v1980_v36 = vadd.f32 %v1979_v35, %v1852_v31  ;;  %v2985_v35 = vld [vmem:[%s4458_s2 + $0xe8] sm:$0xff] }
 0x8d8   : > { %v2019_v37 = vmul.f32 0.01, %v1985_v34 }
 0x8d9   : > { %v2018_v38 = vmul.f32 0.01, %v1980_v36  ;;  %v3350_v39 = vpop.f32.mrb[20].mxu1 }
 0x8da   : > { %v2027_v40 = vmax.f32 %v1985_v34, %v2019_v37  ;;  %v1995_v41 = vadd.f32 %v3350_v39, %v1867_v20  ;;  %v1989_v42 = vpop.f32.mrb[21].mxu1  ;;  %v2982_v34 = vld [vmem:[%s4458_s2 + $0xd0] sm:$0xff]  ;;  %v2987_v37 = vld [vmem:[%s4458_s2 + $0xf8] sm:$0xff]  ;;  %v2169_v39 = vpop.permute.xlu0 %2168 }
 0x8db   : > { %v2026_v44 = vmax.f32 %v1980_v36, %v2018_v38  ;;  %v1990_v45 = vadd.f32 %v1989_v42, %v1862_v33  ;;  %v2981_v33 = vld [vmem:[%s4458_s2 + $0xc8] sm:$0xff]  ;;  %v2986_v36 = vld [vmem:[%s4458_s2 + $0xf0] sm:$0xff]  ;;  %v3004_v38 = vld [vmem:[%s4460_s4 + $0xc0] sm:$0xff] }
 0x8dc   : > { %v2021_v47 = vmul.f32 0.01, %v1995_v41  ;;  %3406 = vmatprep.mubr.msk.f32.mxu1 %vm860_vm6, %v3004_v38 }
 0x8dd   : > { %v2020_v48 = vmul.f32 0.01, %v1990_v45  ;;  %v3353_v49 = vpop.f32.mrb[22].mxu1  ;;  %v3517_v50 = vpack.c.bf16 %v2027_v40, %v2026_v44  ;;  %v2164_v40 = vpop.permute.xlu1 %2163 }
 0x8de   : > { %v2029_v51 = vmax.f32 %v1995_v41, %v2021_v47  ;;  %v2005_v52 = vadd.f32 %v3353_v49, %v1877_v43  ;;  %v1999_v53 = vpop.f32.mrb[23].mxu1  ;;  %v2179_v41 = vpop.permute.xlu0 %2178 }
 0x8df   : > { %v2028_v54 = vmax.f32 %v1990_v45, %v2020_v48  ;;  %v2000_v55 = vadd.f32 %v1999_v53, %v1872_v46  ;;  %3518 = vmatprep.subr.bf16.mxu0 %v3517_v50 }
 0x8e0   : > { %v2023_v56 = vmul.f32 0.01, %v2005_v52  ;;  %3520 = vmatpush3.bf16.msra.mxu0 %v3517_v50 }
 0x8e1   : > { %v2022_v58 = vmul.f32 0.01, %v2000_v55  ;;  %v3356_v59 = vpop.f32.mrb[24].mxu1  ;;  %v3521_v60 = vpack.c.bf16 %v2029_v51, %v2028_v54  ;;  %v2174_v43 = vpop.permute.xlu1 %2173 }
 0x8e2   : > { %v2031_v62 = vmax.f32 %v2005_v52, %v2023_v56  ;;  %v2015_v63 = vadd.f32 %v3356_v59, %v1887_v57  ;;  %v2009_v0 = vpop.f32.mrb[25].mxu1  ;;  %v2189_v53 = vpop.permute.xlu0 %2188 }
 0x8e3   : > { %v2030_v3 = vmax.f32 %v2000_v55, %v2022_v58  ;;  %v2010_v4 = vadd.f32 %v2009_v0, %v1882_v61  ;;  %3522 = vmatprep.subr.bf16.mxu0 %v3521_v60 }
 0x8e4   : > { %v2025_v5 = vmul.f32 0.01, %v2015_v63  ;;  %3524 = vmatpush3.bf16.msra.mxu0 %v3521_v60 }
 0x8e5   : > { %v2024_v6 = vmul.f32 0.01, %v2010_v4  ;;  %v3525_v7 = vpack.c.bf16 %v2031_v62, %v2030_v3  ;;  %v2184_v56 = vpop.permute.xlu1 %2183 }
 0x8e6   : > { %v2033_v8 = vmax.f32 %v2015_v63, %v2025_v5  ;;  %v2199_v5 = vpop.permute.xlu0 %2198 }
 0x8e7   : > { %v2032_v9 = vmax.f32 %v2010_v4, %v2024_v6  ;;  %3526 = vmatprep.subr.bf16.mxu0 %v3525_v7 }
 0x8e8   : > { %3528 = vmatpush3.bf16.msra.mxu0 %v3525_v7 }
 0x8e9   : > { %v3529_v10 = vpack.c.bf16 %v2033_v8, %v2032_v9  ;;  %v2194_v9 = vpop.permute.xlu1 %2193 }
 0x8eb   : > { %3530 = vmatprep.subr.bf16.mxu0 %v3529_v10 }
 0x8ec   : > { %3532 = vmatpush3.bf16.msra.mxu0 %v3529_v10 }
 0x8ef   : > { %3374 = vmatmul.mubr.msk.f32.vlgmr.msra.gmra.mrb[30].mxu0 %vm860_vm6, %v2975_v11 }
 0x8f0   : > { %3378 = vmatprep.mubr.msk.f32.mxu0 %vm658_vm5, %v2980_v12 }
 0x9c2   : > { %v3375_v13 = vpop.f32.mrb[30].mxu0 }
 0x9c3   : > { %v2122_v16 = vpop.f32.mrb[31].mxu0  ;;  %v2128_v31 = vadd.f32 %v3375_v13, %v2048_v14  ;;  %v3010_v14 = vld [vmem:[%s4460_s4 + $0xf0] sm:$0xff] }
 0x9c4   : > { %v2123_v17 = vadd.f32 %v2122_v16, %v2043_v15 }
 0x9c6   : > { %3633 = vtanh.f32 %v2123_v17 }
 0x9d0   : > { %v3634_v18 = vpop.eup %3633 }
 0x9d1   : > { %v2136_v19 = vrot.slane %v3634_v18, 4  ;;  %v2132_v21 = vmul.f32 1.442695, %v3634_v18 }
 0x9d3   : > { %v2137_v23 = vadd.f32 %v3634_v18, %v2136_v19  ;;  %3635 = vpow2.f32 %v2132_v21 }
 0x9d5   : > { %v2138_v22 = vrot.slane %v2137_v23, 2 }
 0x9d7   : > { %v2139_v24 = vadd.f32 %v2138_v22, %v2137_v23  ;;  %v3005_v22 = vld [vmem:[%s4460_s4 + $0xc8] sm:$0xff] }
 0x9d9   : > { %v2140_v26 = vrot.slane %v2139_v24, 1 }
 0x9db   : > { %v2141_v25 = vadd.f32 %v2140_v26, %v2139_v24  ;;  %v3006_v24 = vld [vmem:[%s4460_s4 + $0xd0] sm:$0xff]  ;;  %v3007_v26 = vld [vmem:[%s4460_s4 + $0xd8] sm:$0xff] }
 0x9dd   : > { %v3636_v28 = vpop.eup %3635  ;;  %v4317_v30 = vadd.f32 %v2141_v25, %v4237_v27  ;;  %v2983_v27 = vld [vmem:[%s4458_s2 + $0xd8] sm:$0xff]  ;;  %v3008_v25 = vld [vmem:[%s4460_s4 + $0xe0] sm:$0xff] }
 0x9de   : > { %v2134_v20 = vmul.f32 %v3636_v28, %v4240_v29  ;;  %v2984_v29 = vld [vmem:[%s4458_s2 + $0xe0] sm:$0xff]  ;;  %v3009_v28 = vld [vmem:[%s4460_s4 + $0xe8] sm:$0xff] }
 0x9e0   : > { %v4320_v32 = vadd.f32 %v2134_v20, %v2128_v31  ;;  %v3011_v31 = vld [vmem:[%s4460_s4 + $0xf8] sm:$0xff]  ;;  %v3028_v20 = vld [vmem:[%s4462_s6 + $0x30] sm:$0xff] }
 0x9e2   : > { %3376 = vmatprep.subr.mxu0 %v4320_v32 }
 0x9e3   : > { %3377 = vmatpush3.msra.mxu0 %v4320_v32 }
 0x9e4   : > { %3379 = vmatmul.mubr.msk.f32.vlgmr.msra.gmra.mrb[32].mxu0 %vm658_vm5, %v2981_v33  ;;  %v2372_v33 = vpop.permute.xlu0 %2371 }
 0x9e5   : > { %3381 = vmatprep.mubr.msk.f32.mxu0 %vm658_vm5, %v2982_v34  ;;  %v2367_v34 = vpop.permute.xlu1 %2366 }
 0x9e8   : > { %3382 = vmatmul.mubr.msk.f32.gmra.mrb[34].mxu0 %vm658_vm5, %v2983_v27  ;;  %v2382_v27 = vpop.permute.xlu0 %2381 }
 0x9e9   : > { %3384 = vmatprep.mubr.msk.f32.mxu0 %vm658_vm5, %v2984_v29 }
 0x9ec   : > { %3385 = vmatmul.mubr.msk.f32.gmra.mrb[36].mxu0 %vm658_vm5, %v2985_v35  ;;  %v2377_v35 = vpop.permute.xlu1 %2376 }
 0x9ed   : > { %3387 = vmatprep.mubr.msk.f32.mxu0 %vm658_vm5, %v2986_v36 }
 0x9f0   : > { %3388 = vmatmul.mubr.msk.f32.gmra.mrb[38].mxu0 %vm658_vm5, %v2987_v37 }
 0x9f1   : > { %3434 = vmatprep.mubr.msk.f32.mxu0 %vm860_vm6, %v3028_v20 }
 0xab7   : > { %v3380_v42 = vpop.f32.mrb[32].mxu0 }
 0xab8   : > { %v2297_v44 = vadd.f32 %v3380_v42, %v2169_v39  ;;  %v2291_v45 = vpop.f32.mrb[33].mxu0 }
 0xab9   : > { %v2292_v46 = vadd.f32 %v2291_v45, %v2164_v40  ;;  %v2392_v45 = vpop.permute.xlu0 %2391 }
 0xaba   : > { %v2331_v47 = vmul.f32 0.01, %v2297_v44 }
 0xabb   : > { %v2330_v48 = vmul.f32 0.01, %v2292_v46  ;;  %v3383_v49 = vpop.f32.mrb[34].mxu0 }
 0xabc   : > { %v2339_v50 = vmax.f32 %v2297_v44, %v2331_v47  ;;  %v2307_v51 = vadd.f32 %v3383_v49, %v2179_v41  ;;  %v2301_v52 = vpop.f32.mrb[35].mxu0 }
 0xabd   : > { %v2338_v54 = vmax.f32 %v2292_v46, %v2330_v48  ;;  %v2302_v55 = vadd.f32 %v2301_v52, %v2174_v43  ;;  %v2387_v48 = vpop.permute.xlu1 %2386 }
 0xabe   : > { %v2333_v57 = vmul.f32 0.01, %v2307_v51 }
 0xabf   : > { %v2332_v58 = vmul.f32 0.01, %v2302_v55  ;;  %v3386_v59 = vpop.f32.mrb[36].mxu0  ;;  %v3533_v60 = vpack.c.bf16 %v2339_v50, %v2338_v54 }
 0xac0   : > { %v2341_v61 = vmax.f32 %v2307_v51, %v2333_v57  ;;  %v2317_v62 = vadd.f32 %v3386_v59, %v2189_v53  ;;  %v2311_v63 = vpop.f32.mrb[37].mxu0  ;;  %v2402_v59 = vpop.permute.xlu0 %2401 }
 0xac1   : > { %v2340_v0 = vmax.f32 %v2302_v55, %v2332_v58  ;;  %v2312_v3 = vadd.f32 %v2311_v63, %v2184_v56  ;;  %3534 = vmatprep.subr.bf16.mxu1 %v3533_v60  ;;  %v2397_v63 = vpop.permute.xlu1 %2396 }
 0xac2   : > { %v2335_v4 = vmul.f32 0.01, %v2317_v62  ;;  %3536 = vmatpush3.bf16.msra.mxu1 %v3533_v60 }
 0xac3   : > { %v2334_v6 = vmul.f32 0.01, %v2312_v3  ;;  %v3389_v7 = vpop.f32.mrb[38].mxu0  ;;  %v3537_v8 = vpack.c.bf16 %v2341_v61, %v2340_v0 }
 0xac4   : > { %v2343_v10 = vmax.f32 %v2317_v62, %v2335_v4  ;;  %v2327_v11 = vadd.f32 %v3389_v7, %v2199_v5  ;;  %v2321_v12 = vpop.f32.mrb[39].mxu0 }
 0xac5   : > { %v2342_v13 = vmax.f32 %v2312_v3, %v2334_v6  ;;  %v2322_v15 = vadd.f32 %v2321_v12, %v2194_v9  ;;  %3538 = vmatprep.subr.bf16.mxu1 %v3537_v8 }
 0xac6   : > { %v2337_v16 = vmul.f32 0.01, %v2327_v11  ;;  %3540 = vmatpush3.bf16.msra.mxu1 %v3537_v8 }
 0xac7   : > { %v2336_v17 = vmul.f32 0.01, %v2322_v15  ;;  %v3541_v18 = vpack.c.bf16 %v2343_v10, %v2342_v13  ;;  %v3029_v13 = vld [vmem:[%s4462_s6 + $0x38] sm:$0xff] }
 0xac8   : > { %v2345_v19 = vmax.f32 %v2327_v11, %v2337_v16  ;;  %v2558_v16 = vpop.permute.xlu1 %2557 }
 0xac9   : > { %v2344_v21 = vmax.f32 %v2322_v15, %v2336_v17  ;;  %3542 = vmatprep.subr.bf16.mxu1 %v3541_v18 }
 0xaca   : > { %3544 = vmatpush3.bf16.msra.mxu1 %v3541_v18 }
 0xacb   : > { %v3545_v23 = vpack.c.bf16 %v2345_v19, %v2344_v21 }
 0xacd   : > { %3546 = vmatprep.subr.bf16.mxu1 %v3545_v23 }
 0xace   : > { %3548 = vmatpush3.bf16.msra.mxu1 %v3545_v23 }
 0xad1   : > { %3407 = vmatmul.mubr.msk.f32.vlgmr.msra.gmra.mrb[26].mxu1 %vm860_vm6, %v3005_v22 }
 0xad2   : > { %3409 = vmatprep.mubr.msk.f32.mxu1 %vm860_vm6, %v3006_v24 }
 0xad5   : > { %3410 = vmatmul.mubr.msk.f32.gmra.mrb[28].mxu1 %vm860_vm6, %v3007_v26 }
 0xad6   : > { %3412 = vmatprep.mubr.msk.f32.mxu1 %vm860_vm6, %v3008_v25 }
 0xad9   : > { %3413 = vmatmul.mubr.msk.f32.gmra.mrb[30].mxu1 %vm860_vm6, %v3009_v28 }
 0xada   : > { %3415 = vmatprep.mubr.msk.f32.mxu1 %vm860_vm6, %v3010_v14 }
 0xadd   : > { %3416 = vmatmul.mubr.msk.f32.gmra.mrb[32].mxu1 %vm860_vm6, %v3011_v31  ;;  %v2563_v31 = vpop.permute.xlu0 %2562 }
 0xba4   : > { %v3408_v29 = vpop.f32.mrb[26].mxu1 }
 0xba5   : > { %v2500_v36 = vadd.f32 %v3408_v29, %v2372_v33  ;;  %v2494_v37 = vpop.f32.mrb[27].mxu1 }
 0xba6   : > { %v2495_v38 = vadd.f32 %v2494_v37, %v2367_v34 }
 0xba7   : > { %v2534_v39 = vmul.f32 0.01, %v2500_v36 }
 0xba8   : > { %v2533_v40 = vmul.f32 0.01, %v2495_v38  ;;  %v3411_v41 = vpop.f32.mrb[28].mxu1 }
 0xba9   : > { %v2542_v42 = vmax.f32 %v2500_v36, %v2534_v39  ;;  %v2510_v43 = vadd.f32 %v3411_v41, %v2382_v27  ;;  %v2504_v44 = vpop.f32.mrb[29].mxu1  ;;  %v3034_v27 = vsel %vm2660_vm7, 1.0, %v3721_v1 }
 0xbaa   : > { %v2541_v46 = vmax.f32 %v2495_v38, %v2533_v40  ;;  %v2505_v47 = vadd.f32 %v2504_v44, %v2377_v35 }
 0xbab   : > { %v2536_v49 = vmul.f32 0.01, %v2510_v43 }
 0xbac   : > { %v2535_v50 = vmul.f32 0.01, %v2505_v47  ;;  %v3414_v51 = vpop.f32.mrb[30].mxu1  ;;  %v3549_v52 = vpack.c.bf16 %v2542_v42, %v2541_v46 }
 0xbad   : > { %v2544_v53 = vmax.f32 %v2510_v43, %v2536_v49  ;;  %v2520_v54 = vadd.f32 %v3414_v51, %v2392_v45  ;;  %v2514_v55 = vpop.f32.mrb[31].mxu1 }
 0xbae   : > { %v2543_v56 = vmax.f32 %v2505_v47, %v2535_v50  ;;  %v2515_v57 = vadd.f32 %v2514_v55, %v2387_v48  ;;  %3550 = vmatprep.subr.bf16.mxu0 %v3549_v52 }
 0xbaf   : > { %v2538_v58 = vmul.f32 0.01, %v2520_v54  ;;  %3552 = vmatpush3.bf16.msra.mxu0 %v3549_v52 }
 0xbb0   : > { %v2537_v60 = vmul.f32 0.01, %v2515_v57  ;;  %v3417_v61 = vpop.f32.mrb[32].mxu1  ;;  %v3553_v62 = vpack.c.bf16 %v2544_v53, %v2543_v56 }
 0xbb1   : > { %v2546_v0 = vmax.f32 %v2520_v54, %v2538_v58  ;;  %v2530_v3 = vadd.f32 %v3417_v61, %v2402_v59  ;;  %v2524_v4 = vpop.f32.mrb[33].mxu1 }
 0xbb2   : > { %v2545_v5 = vmax.f32 %v2515_v57, %v2537_v60  ;;  %v2525_v6 = vadd.f32 %v2524_v4, %v2397_v63  ;;  %3554 = vmatprep.subr.bf16.mxu0 %v3553_v62 }
 0xbb3   : > { %v2540_v7 = vmul.f32 0.01, %v2530_v3  ;;  %3556 = vmatpush3.bf16.msra.mxu0 %v3553_v62 }
 0xbb4   : > { %v2539_v8 = vmul.f32 0.01, %v2525_v6  ;;  %v3557_v9 = vpack.c.bf16 %v2546_v0, %v2545_v5 }
 0xbb5   : > { %v2548_v10 = vmax.f32 %v2530_v3, %v2540_v7 }
 0xbb6   : > { %v2547_v11 = vmax.f32 %v2525_v6, %v2539_v8  ;;  %3558 = vmatprep.subr.bf16.mxu0 %v3557_v9 }
 0xbb7   : > { %3560 = vmatpush3.bf16.msra.mxu0 %v3557_v9 }
 0xbb8   : > { %v3561_v12 = vpack.c.bf16 %v2548_v10, %v2547_v11 }
 0xbba   : > { %3562 = vmatprep.subr.bf16.mxu0 %v3561_v12 }
 0xbbb   : > { %3564 = vmatpush3.bf16.msra.mxu0 %v3561_v12 }
 0xbbe   : > { %3435 = vmatmul.mubr.msk.f32.vlgmr.msra.gmra.mrb[40].mxu0 %vm860_vm6, %v3029_v13 }
 0xc91   : > { %v3436_v15 = vpop.f32.mrb[40].mxu0 }
 0xc92   : > { %v2637_v17 = vpop.f32.mrb[41].mxu0  ;;  %v2643_v33 = vadd.f32 %v3436_v15, %v2563_v31 }
 0xc93   : > { %v2638_v18 = vadd.f32 %v2637_v17, %v2558_v16 }
 0xc95   : > { %3637 = vtanh.f32 %v2638_v18 }
 0xc9f   : > { %v3638_v19 = vpop.eup %3637 }
 0xca0   : > { %v2651_v21 = vrot.slane %v3638_v19, 4  ;;  %v2647_v23 = vmul.f32 1.442695, %v3638_v19 }
 0xca2   : > { %v2652_v22 = vadd.f32 %v3638_v19, %v2651_v21  ;;  %3639 = vpow2.f32 %v2647_v23 }
 0xca4   : > { %v2653_v24 = vrot.slane %v2652_v22, 2 }
 0xca6   : > { %v2654_v26 = vadd.f32 %v2653_v24, %v2652_v22 }
 0xca8   : > { %v2655_v25 = vrot.slane %v2654_v26, 1 }
 0xcaa   : > { %v2656_v28 = vadd.f32 %v2655_v25, %v2654_v26 }
 0xcac   : > { %v3640_v14 = vpop.eup %3639  ;;  %v2657_v20 = vadd.f32 %v2656_v28, %v4317_v30 }
 0xcad   : > { %v2649_v34 = vmul.f32 %v3640_v14, %v4320_v32 }
 0xcae   : > { %2659 = vst [vmem:[%s423_s29] sm:$0x1] %v2657_v20  ;;  %s3645_s29 = sshll.u32 %s3724_s24, 4  ;;  %s3646_s29 = int_to_ptr.vmem [resolvable:$false] %s3645_s29 }
 0xcaf   : > { %v2650_v29 = vadd.f32 %v2649_v34, %v2643_v33  ;;  %s3647_s1 = scalar_lea.vmem %s3646_s29, 256  ;;  %p3648_p1 = scmp.lt.s32.totalorder %s4407_s11, %s3646_s29 }
 0xcb0   : > { %p3649_p2 = scmp.lt.s32.totalorder %s3647_s1, %s3641_s20 }
 0xcb1   : > { %2658 = vst [vmem:[%s390_s28] sm:$0xff] %v2650_v29  ;;  %v2663_v2 = vmul.f32 %v3034_v27, %v2650_v29 }
 0xcb2   : > { %p3650_p3 = por %p3649_p2, %p3648_p1 }
 0xcb4   : > { %p3651_p5 = pnand %p3650_p3, %p3644_p0 }
 0xcb6   : > { %3654 = shalt.err (!%p3651_p5)
}
 0xcb7   : > { %s3655_s0 = scalar_lea.hbm %s4405_s22, 128  ;;  %s3659_s12 = scalar_lea.hbm %s4464_s8, 256 }
 0xcb8   : > { %p3656_p6 = scmp.ne.s32.totalorder %s4405_s22, %s3655_s0  ;;  %p3660_p10 = scmp.lt.u32.totalorder %s4405_s22, %s4464_s8 }
 0xcb9   : > { %p3661_p11 = scmp.lt.u32.totalorder %s3659_s12, %s3655_s0  ;;  %p3663_p13 = scmp.lt.u32.totalorder %s3655_s0, %s4405_s22 }
 0xcba   : > { %p3657_p7 = pnand %p3656_p6, %p3820_p4 }
 0xcbb   : > { %p3662_p12 = por %p3661_p11, %p3660_p10 }
 0xcbc   : > { %p3658_p9 = pneg %p3657_p7 }
 0xcbd   : > { %p3664_p0 = por %p3663_p13, %p3662_p12 }
 0xcbf   : > { %p3665_p1 = pnand %p3664_p0, %p3658_p9 }
 0xcc1   : > { %3668 = shalt.err (!%p3665_p1)
}
 0xcc2   : > { %3565 = dma.vmem_to_hbm [thread:$0]  (%p3820_p4), %s4407_s11, 128, %s4405_s22, %s2673_s16   ;;  %v2664_v1 = vmul.f32 %v2663_v2, %v2650_v29 }
 0xcc3   : > { %s429_s29 = scalar_lea.vmem %s4466_s10, %s3839_s27 }
 0xcc4   : > { %v2665_v30 = vrot.slane %v2664_v1, 4 }
 0xcc6   : > { %v2666_v32 = vadd.f32 %v2665_v30, %v2664_v1 }
 0xcc8   : > { %v2667_v35 = vrot.slane %v2666_v32, 2 }
 0xcca   : > { %v2668_v36 = vadd.f32 %v2667_v35, %v2666_v32 }
 0xccc   : > { %v2669_v37 = vrot.slane %v2668_v36, 1 }
 0xcce   : > { %v2670_v38 = vadd.f32 %v2669_v37, %v2668_v36 }
 0xcd0   : > { %2671 = vst [vmem:[%s429_s29] sm:$0x1] %v2670_v38 }
 0xcd1 PF: > { %p3571_p2 = scmp.ge.s32.totalorder %s3719_s18, 2  ;;  %s2717_s23 = sand.u32 1, %s3699_s13  }
 0xcd2   : > { %s2718_s11 = scalar_lea.sflag [#allocation3], %s2717_s23 }
 0xcd3   : > { %p3568_p4 = pnand %p3571_p2, %p3827_p8 }
 0xcd5   : > { %3694 = dma.done.wait (!%p3568_p4), %s2718_s11, 128  }
 0xcd6   : > { %3696 = vsyncadd (!%p3568_p4), %s2718_s11, 4294967168  ;;  %s24_s18 = sadd.s32 1, %s3719_s18   ;;  %s4473_s13 = smov %s3703_s14 }
 0xcd7   : > { %p21_p3 = scmp.ge.s32.totalorder %s24_s18, 4   ;;  %s4474_s14 = smov %s3707_s15 }
 0xcd8   : > { %s4475_s15 = smov %s3833_s26  ;;  %s4476_s16 = smov %s3715_s17 }
 0xcd9   : > { %s4477_s17 = smov %s4479_s21  ;;  %23 = sbr.rel (!%p21_p3) target bundleno = 7 (0x7), region = 132 }
 0xce0   :  { %2741 = vsyncpa [#allocation3], 1 }
 0xce1   :  { %2743 = vsyncpa [#allocation3 + $0x1], 1 }

</bundles_post_ra>
